<compile_context>
chip_gen: v5e
topology: v5e:2x2
jax: 0.10.0
libtpu: 0.0.40
codegen_flags: <defaults>
</compile_context>

<pallas_src>
import functools

import jax
import jax.numpy as jnp
from jax.experimental import pallas as pl
from jax.experimental.pallas import tpu as pltpu


def _round_up(v, m):
    return ((v + m - 1) // m) * m


def _rep_offsets(D, H, W):
    """13 representative neighbor offsets (one per +/- pair), as positive flat
    shifts in the row-major (d, h, w) flattening, with their 3D offsets."""
    HW = H * W
    offs = []
    for od in (0, 1):
        for oh in (-1, 0, 1):
            for ow in (-1, 0, 1):
                if od == 0 and (oh < 0 or (oh == 0 and ow <= 0)):
                    continue  # keep exactly one offset of each {o, -o} pair
                offs.append((od * HW + oh * W + ow, (od, oh, ow)))
    assert len(offs) == 13
    return offs


def _build_consts(D, H, W, offsets):
    """(13 validity-mask rows + 1 half-pad-weight row, N) float32 constants."""
    d = jnp.arange(D, dtype=jnp.int32).reshape(D, 1, 1)
    h = jnp.arange(H, dtype=jnp.int32).reshape(1, H, 1)
    w = jnp.arange(W, dtype=jnp.int32).reshape(1, 1, W)
    ones = jnp.ones((D, H, W), jnp.float32)

    def axis_mask(idx, o, n):
        if o == 0:
            return ones
        if o > 0:
            return (idx < n - 1).astype(jnp.float32) * ones
        return (idx > 0).astype(jnp.float32) * ones

    rows = []
    for _, (od, oh, ow) in offsets:
        m = axis_mask(d, od, D) * axis_mask(h, oh, H) * axis_mask(w, ow, W)
        rows.append(m.reshape(-1))

    vd = 3 - (d == 0).astype(jnp.int32) - (d == D - 1).astype(jnp.int32)
    vh = 3 - (h == 0).astype(jnp.int32) - (h == H - 1).astype(jnp.int32)
    vw = 3 - (w == 0).astype(jnp.int32) - (w == W - 1).astype(jnp.int32)
    weight = (27 - vd * vh * vw).astype(jnp.float32) * ones
    rows.append(0.5 * weight.reshape(-1))   # pre-halved: everything is doubled later
    return jnp.stack(rows, axis=0)          # (14, N)


def _cdl_kernel(x_ref, y_ref, c_ref, o_ref, zs_ref, *, n, shifts):
    # z = x - y in f32.  Block shape: (bc_tile, N), lane-dense.
    z = x_ref[...].astype(jnp.float32) - y_ref[...].astype(jnp.float32)

    # Store the interior once (lane-aligned, dense) and zero only the small
    # right margin the shifted reads can touch (NOT the whole scratch).
    zs_ref[:, :n] = z
    zs_ref[:, n:] = jnp.zeros(
        (zs_ref.shape[0], zs_ref.shape[1] - n), jnp.float32)

    nshift = len(shifts)
    # Pad contribution: (half) per-position weight * |z|.
    acc0 = c_ref[nshift:nshift + 1, :] * jnp.abs(z)
    acc1 = jnp.zeros_like(z)

    # Hot loop: 13 representative offsets.  Each neighbor is a windowed slice
    # of the scratch ref (single windowed vld); masks are (1, N) rows.
    for idx, s in enumerate(shifts):
        zn = zs_ref[:, s:s + n]
        term = c_ref[idx:idx + 1, :] * jnp.abs(z - zn)
        if idx % 2 == 0:
            acc0 = acc0 + term
        else:
            acc1 = acc1 + term

    # One cross-lane reduction per grid step; broadcast the partial sum into
    # this step's (1, 8, 128) output tile (summed outside the kernel).
    o_ref[...] = jnp.zeros_like(o_ref) + jnp.sum(acc0 + acc1)


def centeral_difference_loss(x, y, *, bc_tile=None):
    assert x.shape == y.shape and x.ndim == 5
    B, C, D, H, W = x.shape
    assert H >= 2 and W >= 2 and D >= 1, "kernel requires H >= 2 and W >= 2"
    BC, HW, N = B * C, H * W, D * H * W

    xr = x.reshape(BC, N)
    yr = y.reshape(BC, N)

    offsets = _rep_offsets(D, H, W)
    shifts = tuple(s for s, _ in offsets)
    consts = _build_consts(D, H, W, offsets)        # (14, N) f32
    n_rows = consts.shape[0]

    # Scratch: interior [0, N) plus a zeroed right margin covering the largest
    # positive flat shift (HW + W + 1), rounded up to a full lane tile.
    margin = _round_up(HW + W + 1, 128)
    npad = N + margin

    # ---- VMEM budget / bc_tile selection (per-generation) -------------------
    try:
        vmem_cap = int(pltpu.get_tpu_info().vmem_capacity_bytes)
    except Exception:
        vmem_cap = 64 * 1024 * 1024                 # v7x-safe fallback
    vmem_limit = min(int(vmem_cap * 0.85), 110 * 1024 * 1024)
    budget = vmem_limit // 2                        # headroom for temps/pipeline

    in_bytes = xr.dtype.itemsize

    def est_bytes(t):
        blocks = 2 * 2 * t * N * in_bytes           # x, y double-buffered
        scratch = t * npad * 4
        const_b = 2 * n_rows * N * 4
        temps = 6 * t * N * 4                       # z, acc0, acc1, slack
        return blocks + scratch + const_b + temps

    if bc_tile is None:
        # BlockSpec constraint: second-to-last block dim must be a multiple of
        # 8 or equal to the full extent.
        cands = [t for t in range(1, BC + 1)
                 if BC % t == 0 and (t == BC or t % 8 == 0)]
        fitting = [t for t in cands if est_bytes(t) <= budget]
        bc_tile = max(fitting) if fitting else min(cands)
        # Prefer an even 2-way split (megacore on v7x) only when blocks stay
        # large; on single-core parts splitting tiny blocks is pure overhead.
        if (bc_tile == BC and (BC // 2) in cands
                and (BC // 2) * N * in_bytes >= (2 << 20)
                and est_bytes(BC // 2) <= budget):
            bc_tile = BC // 2
    assert BC % bc_tile == 0 and (bc_tile == BC or bc_tile % 8 == 0), \
        "bc_tile must divide B*C and be a multiple of 8 (or equal B*C)"
    G = BC // bc_tile

    cost = pl.CostEstimate(
        flops=(3 + 4 * len(shifts)) * BC * N,
        transcendentals=0,
        bytes_accessed=(xr.size * in_bytes + yr.size * in_bytes
                        + consts.size * 4 + G * 8 * 128 * 4),
    )

    kern = functools.partial(_cdl_kernel, n=N, shifts=shifts)

    partials = pl.pallas_call(
        kern,
        grid=(G,),
        in_specs=[
            pl.BlockSpec((bc_tile, N), lambda i: (i, 0)),
            pl.BlockSpec((bc_tile, N), lambda i: (i, 0)),
            pl.BlockSpec((n_rows, N), lambda i: (0, 0)),
        ],
        out_specs=pl.BlockSpec((1, 8, 128), lambda i: (i, 0, 0)),
        out_shape=jax.ShapeDtypeStruct((G, 8, 128), jnp.float32),
        scratch_shapes=[pltpu.VMEM((bc_tile, npad), jnp.float32)],
        compiler_params=pltpu.CompilerParams(
            dimension_semantics=("parallel",),
            vmem_limit_bytes=vmem_limit,
        ),
        cost_estimate=cost,
    )(xr, yr, consts)

    # Interior-interior terms were evaluated once per +/- pair and the pad
    # weight was pre-halved, so double everything, then take the mean over the
    # (B, C, 3D, 3H, 3W) expanded tensor.
    return 2.0 * jnp.sum(partials[:, 0, 0]) / jnp.float32(BC * 27 * N)


def _reference_loss(x, y):
    # Pure-JAX reference mirroring the PyTorch module's math.
    B, C, D, H, W = x.shape
    pad = ((0, 0), (0, 0), (1, 1), (1, 1), (1, 1))
    xp = jnp.pad(x, pad)
    yp = jnp.pad(y, pad)
    total = 0.0
    for kd in range(3):
        for kh in range(3):
            for kw in range(3):
                xn = xp[:, :, kd:kd + D, kh:kh + H, kw:kw + W]
                yn = yp[:, :, kd:kd + D, kh:kh + H, kw:kw + W]
                total = total + jnp.sum(jnp.abs((x - xn) - (y - yn)))
    return total / (B * C * 27 * D * H * W)


if __name__ == "__main__":
    key = jax.random.PRNGKey(0)
    kx, ky = jax.random.split(key)
    B, C, D, H, W = 2, 8, 8, 8, 8
    x = jax.random.normal(kx, (B, C, D, H, W), dtype=jnp.float32)
    y = jax.random.normal(ky, (B, C, D, H, W), dtype=jnp.float32)

    ref = jax.block_until_ready(_reference_loss(x, y))

    # Auto-tiled path (single grid step at this size).
    loss_auto = jax.block_until_ready(jax.jit(centeral_difference_loss)(x, y))
    # Explicit bc_tile=8 -> grid of 2 steps, exercising the tiled / per-step
    # partial-sum path (and megacore sharding where available).
    loss_tiled = jax.block_until_ready(
        jax.jit(functools.partial(centeral_difference_loss, bc_tile=8))(x, y))

    assert jnp.allclose(loss_auto, ref, rtol=1e-4, atol=1e-5), (loss_auto, ref)
    assert jnp.allclose(loss_tiled, ref, rtol=1e-4, atol=1e-5), (loss_tiled, ref)

    print("KERNEL_OK")
</pallas_src>

<mosaic_0001>
module attributes {stable_mosaic.version = 11 : i64} {
  func.func @_cdl_kernel(%arg0: i32, %arg1: memref<16x512xf32, #tpu.memory_space<vmem>>, %arg2: memref<16x512xf32, #tpu.memory_space<vmem>>, %arg3: memref<14x512xf32, #tpu.memory_space<vmem>>, %arg4: memref<1x8x128xf32, #tpu.memory_space<vmem>>, %arg5: memref<16x640xf32, #tpu.memory_space<vmem>>) attributes {dimension_semantics = [#tpu.dimension_semantics<parallel>], iteration_bounds = array<i64: 1>, scalar_prefetch = 0 : i64, scratch_operands = 1 : i64, tpu.core_type = #tpu.core_type<tc>, window_params = [{transform_indices = @transform_0, window_bounds = array<i64: 16, 512>}, {transform_indices = @transform_1, window_bounds = array<i64: 16, 512>}, {pipeline_mode = #tpu.pipeline_mode<synchronous>, transform_indices = @transform_2, window_bounds = array<i64: 14, 512>}, {transform_indices = @transform_3, window_bounds = array<i64: 1, 8, 128>}]} {
    %c0 = arith.constant 0 : index
    %c0_0 = arith.constant 0 : index
    %0 = vector.load %arg1[%c0, %c0_0] : memref<16x512xf32, #tpu.memory_space<vmem>>, vector<16x512xf32>
    %c0_1 = arith.constant 0 : index
    %c0_2 = arith.constant 0 : index
    %1 = vector.load %arg2[%c0_1, %c0_2] : memref<16x512xf32, #tpu.memory_space<vmem>>, vector<16x512xf32>
    %2 = arith.subf %0, %1 : vector<16x512xf32>
    %c0_3 = arith.constant 0 : index
    %c0_4 = arith.constant 0 : index
    %3 = vector.load %arg5[%c0_3, %c0_4] : memref<16x640xf32, #tpu.memory_space<vmem>>, vector<16x512xf32>
    tpu.vector_store %arg5[%c0_3, %c0_4], %2 {strides = array<i32>} : memref<16x640xf32, #tpu.memory_space<vmem>>, vector<16x512xf32>,
    %cst = arith.constant 0.000000e+00 : f32
    %4 = vector.broadcast %cst : f32 to vector<16x128xf32>
    %c0_5 = arith.constant 0 : index
    %c512 = arith.constant 512 : index
    %5 = vector.load %arg5[%c0_5, %c512] : memref<16x640xf32, #tpu.memory_space<vmem>>, vector<16x128xf32>
    tpu.vector_store %arg5[%c0_5, %c512], %4 {strides = array<i32>} : memref<16x640xf32, #tpu.memory_space<vmem>>, vector<16x128xf32>,
    %c13 = arith.constant 13 : index
    %c0_6 = arith.constant 0 : index
    %6 = vector.load %arg3[%c13, %c0_6] : memref<14x512xf32, #tpu.memory_space<vmem>>, vector<1x512xf32>
    %7 = math.absf %2 : vector<16x512xf32>
    %8 = vector.broadcast %6 : vector<1x512xf32> to vector<16x512xf32>
    %9 = arith.mulf %8, %7 : vector<16x512xf32>
    %cst_7 = arith.constant 0.000000e+00 : f32
    %10 = vector.broadcast %cst_7 : f32 to vector<16x512xf32>
    %c0_8 = arith.constant 0 : index
    %c1 = arith.constant 1 : index
    %11 = vector.load %arg5[%c0_8, %c1] : memref<16x640xf32, #tpu.memory_space<vmem>>, vector<16x512xf32>
    %c0_9 = arith.constant 0 : index
    %c0_10 = arith.constant 0 : index
    %12 = vector.load %arg3[%c0_9, %c0_10] : memref<14x512xf32, #tpu.memory_space<vmem>>, vector<1x512xf32>
    %13 = arith.subf %2, %11 : vector<16x512xf32>
    %14 = math.absf %13 : vector<16x512xf32>
    %15 = vector.broadcast %12 : vector<1x512xf32> to vector<16x512xf32>
    %16 = arith.mulf %15, %14 : vector<16x512xf32>
    %17 = arith.addf %9, %16 : vector<16x512xf32>
    %c0_11 = arith.constant 0 : index
    %c7 = arith.constant 7 : index
    %18 = vector.load %arg5[%c0_11, %c7] : memref<16x640xf32, #tpu.memory_space<vmem>>, vector<16x512xf32>
    %c1_12 = arith.constant 1 : index
    %c0_13 = arith.constant 0 : index
    %19 = vector.load %arg3[%c1_12, %c0_13] : memref<14x512xf32, #tpu.memory_space<vmem>>, vector<1x512xf32>
    %20 = arith.subf %2, %18 : vector<16x512xf32>
    %21 = math.absf %20 : vector<16x512xf32>
    %22 = vector.broadcast %19 : vector<1x512xf32> to vector<16x512xf32>
    %23 = arith.mulf %22, %21 : vector<16x512xf32>
    %24 = arith.addf %10, %23 : vector<16x512xf32>
    %c0_14 = arith.constant 0 : index
    %c8 = arith.constant 8 : index
    %25 = vector.load %arg5[%c0_14, %c8] : memref<16x640xf32, #tpu.memory_space<vmem>>, vector<16x512xf32>
    %c2 = arith.constant 2 : index
    %c0_15 = arith.constant 0 : index
    %26 = vector.load %arg3[%c2, %c0_15] : memref<14x512xf32, #tpu.memory_space<vmem>>, vector<1x512xf32>
    %27 = arith.subf %2, %25 : vector<16x512xf32>
    %28 = math.absf %27 : vector<16x512xf32>
    %29 = vector.broadcast %26 : vector<1x512xf32> to vector<16x512xf32>
    %30 = arith.mulf %29, %28 : vector<16x512xf32>
    %31 = arith.addf %17, %30 : vector<16x512xf32>
    %c0_16 = arith.constant 0 : index
    %c9 = arith.constant 9 : index
    %32 = vector.load %arg5[%c0_16, %c9] : memref<16x640xf32, #tpu.memory_space<vmem>>, vector<16x512xf32>
    %c3 = arith.constant 3 : index
    %c0_17 = arith.constant 0 : index
    %33 = vector.load %arg3[%c3, %c0_17] : memref<14x512xf32, #tpu.memory_space<vmem>>, vector<1x512xf32>
    %34 = arith.subf %2, %32 : vector<16x512xf32>
    %35 = math.absf %34 : vector<16x512xf32>
    %36 = vector.broadcast %33 : vector<1x512xf32> to vector<16x512xf32>
    %37 = arith.mulf %36, %35 : vector<16x512xf32>
    %38 = arith.addf %24, %37 : vector<16x512xf32>
    %c0_18 = arith.constant 0 : index
    %c55 = arith.constant 55 : index
    %39 = vector.load %arg5[%c0_18, %c55] : memref<16x640xf32, #tpu.memory_space<vmem>>, vector<16x512xf32>
    %c4 = arith.constant 4 : index
    %c0_19 = arith.constant 0 : index
    %40 = vector.load %arg3[%c4, %c0_19] : memref<14x512xf32, #tpu.memory_space<vmem>>, vector<1x512xf32>
    %41 = arith.subf %2, %39 : vector<16x512xf32>
    %42 = math.absf %41 : vector<16x512xf32>
    %43 = vector.broadcast %40 : vector<1x512xf32> to vector<16x512xf32>
    %44 = arith.mulf %43, %42 : vector<16x512xf32>
    %45 = arith.addf %31, %44 : vector<16x512xf32>
    %c0_20 = arith.constant 0 : index
    %c56 = arith.constant 56 : index
    %46 = vector.load %arg5[%c0_20, %c56] : memref<16x640xf32, #tpu.memory_space<vmem>>, vector<16x512xf32>
    %c5 = arith.constant 5 : index
    %c0_21 = arith.constant 0 : index
    %47 = vector.load %arg3[%c5, %c0_21] : memref<14x512xf32, #tpu.memory_space<vmem>>, vector<1x512xf32>
    %48 = arith.subf %2, %46 : vector<16x512xf32>
    %49 = math.absf %48 : vector<16x512xf32>
    %50 = vector.broadcast %47 : vector<1x512xf32> to vector<16x512xf32>
    %51 = arith.mulf %50, %49 : vector<16x512xf32>
    %52 = arith.addf %38, %51 : vector<16x512xf32>
    %c0_22 = arith.constant 0 : index
    %c57 = arith.constant 57 : index
    %53 = vector.load %arg5[%c0_22, %c57] : memref<16x640xf32, #tpu.memory_space<vmem>>, vector<16x512xf32>
    %c6 = arith.constant 6 : index
    %c0_23 = arith.constant 0 : index
    %54 = vector.load %arg3[%c6, %c0_23] : memref<14x512xf32, #tpu.memory_space<vmem>>, vector<1x512xf32>
    %55 = arith.subf %2, %53 : vector<16x512xf32>
    %56 = math.absf %55 : vector<16x512xf32>
    %57 = vector.broadcast %54 : vector<1x512xf32> to vector<16x512xf32>
    %58 = arith.mulf %57, %56 : vector<16x512xf32>
    %59 = arith.addf %45, %58 : vector<16x512xf32>
    %c0_24 = arith.constant 0 : index
    %c63 = arith.constant 63 : index
    %60 = vector.load %arg5[%c0_24, %c63] : memref<16x640xf32, #tpu.memory_space<vmem>>, vector<16x512xf32>
    %c7_25 = arith.constant 7 : index
    %c0_26 = arith.constant 0 : index
    %61 = vector.load %arg3[%c7_25, %c0_26] : memref<14x512xf32, #tpu.memory_space<vmem>>, vector<1x512xf32>
    %62 = arith.subf %2, %60 : vector<16x512xf32>
    %63 = math.absf %62 : vector<16x512xf32>
    %64 = vector.broadcast %61 : vector<1x512xf32> to vector<16x512xf32>
    %65 = arith.mulf %64, %63 : vector<16x512xf32>
    %66 = arith.addf %52, %65 : vector<16x512xf32>
    %c0_27 = arith.constant 0 : index
    %c64 = arith.constant 64 : index
    %67 = vector.load %arg5[%c0_27, %c64] : memref<16x640xf32, #tpu.memory_space<vmem>>, vector<16x512xf32>
    %c8_28 = arith.constant 8 : index
    %c0_29 = arith.constant 0 : index
    %68 = vector.load %arg3[%c8_28, %c0_29] : memref<14x512xf32, #tpu.memory_space<vmem>>, vector<1x512xf32>
    %69 = arith.subf %2, %67 : vector<16x512xf32>
    %70 = math.absf %69 : vector<16x512xf32>
    %71 = vector.broadcast %68 : vector<1x512xf32> to vector<16x512xf32>
    %72 = arith.mulf %71, %70 : vector<16x512xf32>
    %73 = arith.addf %59, %72 : vector<16x512xf32>
    %c0_30 = arith.constant 0 : index
    %c65 = arith.constant 65 : index
    %74 = vector.load %arg5[%c0_30, %c65] : memref<16x640xf32, #tpu.memory_space<vmem>>, vector<16x512xf32>
    %c9_31 = arith.constant 9 : index
    %c0_32 = arith.constant 0 : index
    %75 = vector.load %arg3[%c9_31, %c0_32] : memref<14x512xf32, #tpu.memory_space<vmem>>, vector<1x512xf32>
    %76 = arith.subf %2, %74 : vector<16x512xf32>
    %77 = math.absf %76 : vector<16x512xf32>
    %78 = vector.broadcast %75 : vector<1x512xf32> to vector<16x512xf32>
    %79 = arith.mulf %78, %77 : vector<16x512xf32>
    %80 = arith.addf %66, %79 : vector<16x512xf32>
    %c0_33 = arith.constant 0 : index
    %c71 = arith.constant 71 : index
    %81 = vector.load %arg5[%c0_33, %c71] : memref<16x640xf32, #tpu.memory_space<vmem>>, vector<16x512xf32>
    %c10 = arith.constant 10 : index
    %c0_34 = arith.constant 0 : index
    %82 = vector.load %arg3[%c10, %c0_34] : memref<14x512xf32, #tpu.memory_space<vmem>>, vector<1x512xf32>
    %83 = arith.subf %2, %81 : vector<16x512xf32>
    %84 = math.absf %83 : vector<16x512xf32>
    %85 = vector.broadcast %82 : vector<1x512xf32> to vector<16x512xf32>
    %86 = arith.mulf %85, %84 : vector<16x512xf32>
    %87 = arith.addf %73, %86 : vector<16x512xf32>
    %c0_35 = arith.constant 0 : index
    %c72 = arith.constant 72 : index
    %88 = vector.load %arg5[%c0_35, %c72] : memref<16x640xf32, #tpu.memory_space<vmem>>, vector<16x512xf32>
    %c11 = arith.constant 11 : index
    %c0_36 = arith.constant 0 : index
    %89 = vector.load %arg3[%c11, %c0_36] : memref<14x512xf32, #tpu.memory_space<vmem>>, vector<1x512xf32>
    %90 = arith.subf %2, %88 : vector<16x512xf32>
    %91 = math.absf %90 : vector<16x512xf32>
    %92 = vector.broadcast %89 : vector<1x512xf32> to vector<16x512xf32>
    %93 = arith.mulf %92, %91 : vector<16x512xf32>
    %94 = arith.addf %80, %93 : vector<16x512xf32>
    %c0_37 = arith.constant 0 : index
    %c73 = arith.constant 73 : index
    %95 = vector.load %arg5[%c0_37, %c73] : memref<16x640xf32, #tpu.memory_space<vmem>>, vector<16x512xf32>
    %c12 = arith.constant 12 : index
    %c0_38 = arith.constant 0 : index
    %96 = vector.load %arg3[%c12, %c0_38] : memref<14x512xf32, #tpu.memory_space<vmem>>, vector<1x512xf32>
    %97 = arith.subf %2, %95 : vector<16x512xf32>
    %98 = math.absf %97 : vector<16x512xf32>
    %99 = vector.broadcast %96 : vector<1x512xf32> to vector<16x512xf32>
    %100 = arith.mulf %99, %98 : vector<16x512xf32>
    %101 = arith.addf %87, %100 : vector<16x512xf32>
    %cst_39 = arith.constant 0.000000e+00 : f32
    %102 = vector.broadcast %cst_39 : f32 to vector<1x8x128xf32>
    %103 = arith.addf %101, %94 : vector<16x512xf32>
    %104 = vector.shape_cast %103 : vector<16x512xf32> to vector<1x16x512xf32>
    %cst_40 = arith.constant dense<0.000000e+00> : vector<1xf32>
    %105 = vector.multi_reduction <add>, %104, %cst_40 [1, 2] : vector<1x16x512xf32> to vector<1xf32>
    %106 = vector.shape_cast %105 : vector<1xf32> to vector<1x1x1xf32>
    %107 = vector.extract %106[0, 0, 0] : f32 from vector<1x1x1xf32>
    %108 = vector.broadcast %107 : f32 to vector<1x8x128xf32>
    %109 = arith.addf %102, %108 : vector<1x8x128xf32>
    %c0_41 = arith.constant 0 : index
    %c0_42 = arith.constant 0 : index
    %c0_43 = arith.constant 0 : index
    %110 = vector.load %arg4[%c0_41, %c0_42, %c0_43] : memref<1x8x128xf32, #tpu.memory_space<vmem>>, vector<1x8x128xf32>
    tpu.vector_store %arg4[%c0_41, %c0_42, %c0_43], %109 {strides = array<i32>} : memref<1x8x128xf32, #tpu.memory_space<vmem>>, vector<1x8x128xf32>,
    return
  }
  func.func @transform_0(%arg0: i32) -> (i32, i32) {
    %c0_i32 = arith.constant 0 : i32
    %c0_i32_0 = arith.constant 0 : i32
    return %arg0, %c0_i32 : i32, i32
  }
  func.func @transform_1(%arg0: i32) -> (i32, i32) {
    %c0_i32 = arith.constant 0 : i32
    %c0_i32_0 = arith.constant 0 : i32
    return %arg0, %c0_i32 : i32, i32
  }
  func.func @transform_2(%arg0: i32) -> (i32, i32) {
    %c0_i32 = arith.constant 0 : i32
    %c0_i32_0 = arith.constant 0 : i32
    %c0_i32_1 = arith.constant 0 : i32
    return %c0_i32, %c0_i32_0 : i32, i32
  }
  func.func @transform_3(%arg0: i32) -> (i32, i32, i32) {
    %c0_i32 = arith.constant 0 : i32
    %c0_i32_0 = arith.constant 0 : i32
    %c0_i32_1 = arith.constant 0 : i32
    return %arg0, %c0_i32, %c0_i32_0 : i32, i32, i32
  }
}

</mosaic_0001>

<bundles_post_ra>
// kernel: centeral_difference_loss.1
= control target key start
LH: loop header
LB: loop body
LE: loop exit
PB: predicated region body
PF: predicated region fallthrough
CT: control target
= control target key end

     0   :  { %v1249_v5 = vmov 0.0   ;;  %s1250_s20 = smov 127   ;;  %s1251_s18 = smov 121   ;;  %vm116_vm0 = vcmask 1039360   ;;  %vm196_vm1 = vcmask 990208   ;;  %vm276_vm2 = vcmask 982016   ;;  %s2344_s0 = inlined_call_operand.vmem [shape: f32[16,512], index: 0, kind: input, shape index: {}]   ;;  %s2345_s1 = inlined_call_operand.vmem [shape: f32[16,512], index: 1, kind: input, shape index: {}]   ;;  %s2346_s2 = inlined_call_operand.vmem [shape: f32[14,512], index: 2, kind: input, shape index: {}]   ;;  %s2347_s3 = inlined_call_operand.vmem [shape: f32[1,8,128], index: 3, kind: output, shape index: {}]  }
   0x1   :  { %v16_v0 = vld [vmem:[%s2344_s0 + $0x10] sm:$0xff]  ;;  %v14_v2 = vld [vmem:[%s2344_s0] sm:$0xff]  ;;  %1195 = vrot.lane.b32.xlu2 %v1249_v5, %s1250_s20  ;;  %v17_v9 = vld [vmem:[%s2344_s0 + $0x18] sm:$0xff]  ;;  %s1254_s19 = smov 73   ;;  %s1256_s21 = smov 71   ;;  %vm356_vm3 = vcmask 973824  }
   0x2   :  { %v24_v1 = vld [vmem:[%s2345_s1 + $0x10] sm:$0xff]  ;;  %v22_v4 = vld [vmem:[%s2345_s1] sm:$0xff]  ;;  %v25_v10 = vld [vmem:[%s2345_s1 + $0x18] sm:$0xff]  ;;  %s1257_s28 = smov 65   ;;  %s1258_s29 = smov 64   ;;  %vm436_vm4 = vcmask 596992  }
   0x3   :  { %v1292_v3 = vsub.f32 %v16_v0, %v24_v1  ;;  %v1298_v6 = vsub.f32 %v14_v2, %v22_v4  ;;  %v18_v7 = vld [vmem:[%s2344_s0 + $0x20] sm:$0xff]  ;;  %v15_v11 = vld [vmem:[%s2344_s0 + $0x8] sm:$0xff]  ;;  %v1322_v14 = vsub.f32 %v17_v9, %v25_v10  ;;  %v21_v16 = vld [vmem:[%s2344_s0 + $0x38] sm:$0xff]  ;;  %s1259_s7 = smov 63   ;;  %s1260_s8 = smov 57   ;;  %vm516_vm5 = vcmask 588800  }
   0x4   :  { %v26_v8 = vld [vmem:[%s2345_s1 + $0x20] sm:$0xff]  ;;  %v23_v12 = vld [vmem:[%s2345_s1 + $0x8] sm:$0xff]  ;;  %v29_v17 = vld [vmem:[%s2345_s1 + $0x38] sm:$0xff]  ;;  %s1261_s11 = smov 56   ;;  %s1262_s12 = smov 55   ;;  %vm596_vm6 = vcmask 580608  }
   0x5   :  { %100 = vrot.lane.b32.xlu1 %v1292_v3, %s1250_s20  ;;  %96 = vrot.lane.b32.xlu0 %v1298_v6, %s1250_s20  ;;  %v1320_v13 = vsub.f32 %v18_v7, %v26_v8  ;;  %v1324_v15 = vsub.f32 %v15_v11, %v23_v12  ;;  %v20_v18 = vld [vmem:[%s2344_s0 + $0x30] sm:$0xff]  ;;  %v19_v20 = vld [vmem:[%s2344_s0 + $0x28] sm:$0xff]  ;;  %v1347_v22 = vsub.f32 %v21_v16, %v29_v17  ;;  %s1252_s0 = smov 120   ;;  %v53_v12 = vand.u32 2147483647, %v1322_v14 }
   0x6   :  { %v28_v19 = vld [vmem:[%s2345_s1 + $0x30] sm:$0xff]  ;;  %v27_v21 = vld [vmem:[%s2345_s1 + $0x28] sm:$0xff]  ;;  %s1253_s1 = smov 119   ;;  %vm676_vm7 = vcmask 531456   ;;  %vm916_vm8 = vcmask 465920   ;;  %vm756_vm9 = vcmask 523264  }
   0x7   :  { %v1349_v23 = vsub.f32 %v20_v18, %v28_v19  ;;  %v1351_v24 = vsub.f32 %v19_v20, %v27_v21  ;;  %v1457_v62 = vld [vmem:[%s2346_s2 + $0x25] ss:$8 sm:$0xf]  ;;  %v1462_v63 = vld [vmem:[%s2346_s2] ss:$8 sm:$0xf] }
   0x8   :  { %v57_v9 = vand.u32 2147483647, %v1347_v22  ;;  %v62_v10 = vperm.slane %v1457_v62, 3  ;;  %v153_v11 = vperm.slane %v1462_v63, 3  ;;  %v51_v16 = vand.u32 2147483647, %v1324_v15 }
   0x9   :  { %106 = vrot.lane.b32.xlu2 %v1320_v13, %s1250_s20  ;;  %v59_v17 = vperm.slane %v1457_v62, 0  ;;  %v60_v18 = vperm.slane %v1457_v62, 1  ;;  %v151_v19 = vperm.slane %v1462_v63, 1  ;;  %v50_v20 = vand.u32 2147483647, %v1298_v6 }
   0xa   :  { %vm836_vm10 = vcmask 515072   ;;  %vm1076_vm11 = vcmask 449536   ;;  %vm996_vm12 = vcmask 457728  }
   0xd   :  { %102 = vrot.lane.b32.xlu1 %v1322_v14, %s1250_s20  ;;  %98 = vrot.lane.b32.xlu0 %v1324_v15, %s1250_s20 }
  0x11   :  { %112 = vrot.lane.b32.xlu2 %v1347_v22, %s1250_s20 }
  0x15   :  { %110 = vrot.lane.b32.xlu1 %v1349_v23, %s1250_s20  ;;  %108 = vrot.lane.b32.xlu0 %v1351_v24, %s1250_s20  ;;  %s1255_s20 = smov 72  }
  0x19   :  { %180 = vrot.lane.b32.xlu2 %v1292_v3, %s1251_s18 }
  0x1d   :  { %178 = vrot.lane.b32.xlu1 %v1324_v15, %s1251_s18  ;;  %176 = vrot.lane.b32.xlu0 %v1298_v6, %s1251_s18 }
  0x21   :  { %186 = vrot.lane.b32.xlu2 %v1320_v13, %s1251_s18 }
  0x25   :  { %1200 = vrot.lane.b32.xlu1 %v1249_v5, %s1251_s18  ;;  %182 = vrot.lane.b32.xlu0 %v1322_v14, %s1251_s18 }
  0x29   :  { %192 = vrot.lane.b32.xlu2 %v1347_v22, %s1251_s18 }
  0x2d   :  { %190 = vrot.lane.b32.xlu1 %v1349_v23, %s1251_s18  ;;  %188 = vrot.lane.b32.xlu0 %v1351_v24, %s1251_s18 }
  0x31   :  { %260 = vrot.lane.b32.xlu2 %v1292_v3, %s1252_s0 }
  0x35   :  { %258 = vrot.lane.b32.xlu1 %v1324_v15, %s1252_s0  ;;  %256 = vrot.lane.b32.xlu0 %v1298_v6, %s1252_s0 }
  0x39   :  { %266 = vrot.lane.b32.xlu2 %v1320_v13, %s1252_s0 }
  0x3d   :  { %1205 = vrot.lane.b32.xlu1 %v1249_v5, %s1252_s0  ;;  %262 = vrot.lane.b32.xlu0 %v1322_v14, %s1252_s0 }
  0x41   :  { %272 = vrot.lane.b32.xlu2 %v1347_v22, %s1252_s0 }
  0x45   :  { %270 = vrot.lane.b32.xlu1 %v1349_v23, %s1252_s0  ;;  %268 = vrot.lane.b32.xlu0 %v1351_v24, %s1252_s0 }
  0x49   :  { %340 = vrot.lane.b32.xlu2 %v1292_v3, %s1253_s1 }
  0x4d   :  { %338 = vrot.lane.b32.xlu1 %v1324_v15, %s1253_s1  ;;  %336 = vrot.lane.b32.xlu0 %v1298_v6, %s1253_s1 }
  0x51   :  { %346 = vrot.lane.b32.xlu2 %v1320_v13, %s1253_s1 }
  0x55   :  { %1210 = vrot.lane.b32.xlu1 %v1249_v5, %s1253_s1  ;;  %342 = vrot.lane.b32.xlu0 %v1322_v14, %s1253_s1 }
  0x59   :  { %352 = vrot.lane.b32.xlu2 %v1347_v22, %s1253_s1 }
  0x5b   :  { %v1196_v25 = vpop.permute.xlu2 %1195 }
  0x5c   :  { %v1198_v27 = vunpack.i.h.bf16 %v1196_v25  ;;  %v1197_v33 = vunpack.i.l.bf16 %v1196_v25  ;;  %v150_v25 = vperm.slane %v1462_v63, 0 }
  0x5d   :  { %350 = vrot.lane.b32.xlu1 %v1349_v23, %s1253_s1  ;;  %348 = vrot.lane.b32.xlu0 %v1351_v24, %s1253_s1 }
  0x61   :  { %420 = vrot.lane.b32.xlu2 %v1292_v3, %s1254_s19 }
  0x63   :  { %v107_v26 = vpop.permute.xlu2 %106 }
  0x65   :  { %418 = vrot.lane.b32.xlu1 %v1324_v15, %s1254_s19  ;;  %416 = vrot.lane.b32.xlu0 %v1298_v6, %s1254_s19 }
  0x69   :  { %426 = vrot.lane.b32.xlu2 %v1320_v13, %s1254_s19 }
  0x6b   :  { %v113_v28 = vpop.permute.xlu2 %112 }
  0x6c   :  { %v1390_v29 = vsel %vm116_vm0, %v113_v28, %v1198_v27 }
  0x6d   :  { %1215 = vrot.lane.b32.xlu1 %v1249_v5, %s1254_s19  ;;  %422 = vrot.lane.b32.xlu0 %v1322_v14, %s1254_s19 }
  0x71   :  { %432 = vrot.lane.b32.xlu2 %v1347_v22, %s1254_s19 }
  0x73   :  { %v181_v30 = vpop.permute.xlu2 %180 }
  0x75   :  { %430 = vrot.lane.b32.xlu1 %v1349_v23, %s1254_s19  ;;  %428 = vrot.lane.b32.xlu0 %v1351_v24, %s1254_s19 }
  0x77   :  { %v101_v31 = vpop.permute.xlu1 %100  ;;  %v97_v32 = vpop.permute.xlu0 %96 }
  0x79   :  { %500 = vrot.lane.b32.xlu2 %v1292_v3, %s1255_s20 }
  0x7b   :  { %v187_v34 = vpop.permute.xlu2 %186 }
  0x7d   :  { %498 = vrot.lane.b32.xlu1 %v1324_v15, %s1255_s20  ;;  %496 = vrot.lane.b32.xlu0 %v1298_v6, %s1255_s20 }
  0x7f   :  { %v103_v35 = vpop.permute.xlu1 %102  ;;  %v99_v38 = vpop.permute.xlu0 %98 }
  0x80   :  { %v1399_v36 = vsel %vm116_vm0, %v101_v31, %v103_v35  ;;  %v1402_v37 = vsel %vm116_vm0, %v103_v35, %v1197_v33  ;;  %v117_v39 = vsel %vm116_vm0, %v97_v32, %v99_v38  ;;  %v118_v40 = vsel %vm116_vm0, %v99_v38, %v101_v31 }
  0x81   :  { %506 = vrot.lane.b32.xlu2 %v1320_v13, %s1255_s20  ;;  %v134_v2 = vsub.f32 %v1324_v15, %v118_v40  ;;  %v133_v8 = vsub.f32 %v1298_v6, %v117_v39  ;;  %v61_v31 = vperm.slane %v1457_v62, 2  ;;  %v152_v32 = vperm.slane %v1462_v63, 2  ;;  %v1602_v62 = vld [vmem:[%s2346_s2 + $0x1] ss:$8 sm:$0xf] }
  0x82   :  { %v135_v33 = vsub.f32 %v1292_v3, %v1399_v36  ;;  %v52_v35 = vand.u32 2147483647, %v1292_v3  ;;  %v136_v38 = vsub.f32 %v1322_v14, %v1402_v37  ;;  %v68_v39 = vmul.f32 %v60_v18, %v51_v16 }
  0x83   :  { %v193_v41 = vpop.permute.xlu2 %192  ;;  %v142_v21 = vand.u32 2147483647, %v134_v2 }
  0x84   :  { %v144_v2 = vand.u32 2147483647, %v136_v38  ;;  %v56_v38 = vand.u32 2147483647, %v1349_v23 }
  0x85   :  { %1220 = vrot.lane.b32.xlu1 %v1249_v5, %s1255_s20  ;;  %502 = vrot.lane.b32.xlu0 %v1322_v14, %s1255_s20 }
  0x87   :  { %v111_v42 = vpop.permute.xlu1 %110  ;;  %v109_v44 = vpop.permute.xlu0 %108 }
  0x88   :  { %v1410_v43 = vsel %vm116_vm0, %v111_v42, %v113_v28  ;;  %v1413_v45 = vsel %vm116_vm0, %v107_v26, %v109_v44  ;;  %v1416_v46 = vsel %vm116_vm0, %v109_v44, %v111_v42  ;;  %v141_v26 = vand.u32 2147483647, %v133_v8  ;;  %v1496_v28 = vld [vmem:[%s2346_s2 + $0x2] ss:$8 sm:$0xf] }
  0x89   :  { %512 = vrot.lane.b32.xlu2 %v1347_v22, %s1255_s20  ;;  %v311_v42 = vperm.slane %v1496_v28, 1 }
  0x8a   :  { %v158_v37 = vmul.f32 %v150_v25, %v141_v26 }
  0x8b   :  { %v1421_v47 = vpop.permute.xlu2 %260 }
  0x8d   :  { %510 = vrot.lane.b32.xlu1 %v1349_v23, %s1255_s20  ;;  %508 = vrot.lane.b32.xlu0 %v1351_v24, %s1255_s20 }
  0x8f   :  { %v179_v48 = vpop.permute.xlu1 %178  ;;  %v177_v50 = vpop.permute.xlu0 %176 }
  0x90   :  { %v1424_v49 = vsel %vm196_vm1, %v179_v48, %v181_v30  ;;  %v1427_v51 = vsel %vm196_vm1, %v177_v50, %v179_v48  ;;  %v67_v48 = vmul.f32 %v59_v17, %v50_v20  ;;  %v310_v50 = vperm.slane %v1496_v28, 0 }
  0x91   :  { %580 = vrot.lane.b32.xlu2 %v1292_v3, %s1256_s21  ;;  %v70_v20 = vmul.f32 %v62_v10, %v53_v12  ;;  %v139_v12 = vsub.f32 %v1349_v23, %v1410_v43 }
  0x92   :  { %v166_v26 = vadd.f32 %v158_v37, %v67_v48 }
  0x93   :  { %v1435_v52 = vpop.permute.xlu2 %266 }
  0x95   :  { %578 = vrot.lane.b32.xlu1 %v1324_v15, %s1256_s21  ;;  %576 = vrot.lane.b32.xlu0 %v1298_v6, %s1256_s21 }
  0x97   :  { %v1201_v53 = vpop.permute.xlu1 %1200  ;;  %v183_v56 = vpop.permute.xlu0 %182 }
  0x98   :  { %v1203_v54 = vunpack.i.h.bf16 %v1201_v53  ;;  %v1202_v55 = vunpack.i.l.bf16 %v1201_v53  ;;  %v1438_v57 = vsel %vm196_vm1, %v181_v30, %v183_v56  ;;  %v140_v30 = vsub.f32 %v1347_v22, %v1390_v29 }
  0x99   :  { %586 = vrot.lane.b32.xlu2 %v1320_v13, %s1256_s21 }
  0x9a   :  { %v1441_v58 = vsel %vm196_vm1, %v193_v41, %v1203_v54  ;;  %v1444_v59 = vsel %vm196_vm1, %v183_v56, %v1202_v55  ;;  %v148_v54 = vand.u32 2147483647, %v140_v30  ;;  %v143_v55 = vand.u32 2147483647, %v135_v33 }
  0x9b   :  { %v1452_v60 = vpop.permute.xlu2 %272 }
  0x9c   :  { %v165_v33 = vmul.f32 %v153_v11, %v148_v54 }
  0x9d   :  { %1225 = vrot.lane.b32.xlu1 %v1249_v5, %s1256_s21  ;;  %582 = vrot.lane.b32.xlu0 %v1322_v14, %s1256_s21 }
  0x9f   :  { %v191_v61 = vpop.permute.xlu1 %190  ;;  %v189_v1 = vpop.permute.xlu0 %188 }
  0xa0   :  { %v1465_v0 = vsel %vm196_vm1, %v191_v61, %v193_v41  ;;  %v1469_v4 = vsel %vm196_vm1, %v187_v34, %v189_v1  ;;  %v1472_v7 = vsel %vm196_vm1, %v189_v1, %v191_v61  ;;  %v159_v41 = vmul.f32 %v151_v19, %v142_v21 }
  0xa1   :  { %592 = vrot.lane.b32.xlu2 %v1347_v22, %s1256_s21  ;;  %v74_v1 = vmul.f32 %v62_v10, %v57_v9  ;;  %v69_v21 = vmul.f32 %v61_v31, %v52_v35 }
  0xa2   :  { %v167_v8 = vadd.f32 %v159_v41, %v68_v39 }
  0xa3   :  { %v1491_v27 = vpop.permute.xlu2 %340 }
  0xa5   :  { %590 = vrot.lane.b32.xlu1 %v1349_v23, %s1256_s21  ;;  %588 = vrot.lane.b32.xlu0 %v1351_v24, %s1256_s21 }
  0xa7   :  { %v259_v34 = vpop.permute.xlu1 %258  ;;  %v257_v29 = vpop.permute.xlu0 %256 }
  0xa8   :  { %v278_v40 = vsel %vm276_vm2, %v259_v34, %v1421_v47  ;;  %v277_v44 = vsel %vm276_vm2, %v257_v29, %v259_v34  ;;  %v160_v34 = vmul.f32 %v152_v32, %v143_v55  ;;  %v138_v55 = vsub.f32 %v1351_v24, %v1416_v46 }
  0xa9   :  { %v294_v36 = vsub.f32 %v1324_v15, %v278_v40  ;;  %v293_v53 = vsub.f32 %v1298_v6, %v277_v44  ;;  %660 = vrot.lane.b32.xlu2 %v1292_v3, %s1257_s28  ;;  %v137_v44 = vsub.f32 %v1320_v13, %v1413_v45  ;;  %v173_v46 = vadd.f32 %v165_v33, %v74_v1 }
  0xab   :  { %v302_v56 = vand.u32 2147483647, %v294_v36  ;;  %v301_v61 = vand.u32 2147483647, %v293_v53  ;;  %v1534_v9 = vpop.permute.xlu2 %346  ;;  %v161_v36 = vmul.f32 %v153_v11, %v144_v2  ;;  %v312_v53 = vperm.slane %v1496_v28, 2 }
  0xad   :  { %v319_v16 = vmul.f32 %v311_v42, %v302_v56  ;;  %658 = vrot.lane.b32.xlu1 %v1324_v15, %s1257_s28  ;;  %v318_v30 = vmul.f32 %v310_v50, %v301_v61  ;;  %656 = vrot.lane.b32.xlu0 %v1298_v6, %s1257_s28  ;;  %v313_v56 = vperm.slane %v1496_v28, 3  ;;  %v147_v61 = vand.u32 2147483647, %v139_v12 }
  0xae   :  { %v230_v28 = vperm.slane %v1602_v62, 0 }
  0xaf   :  { %v1539_v39 = vadd.f32 %v319_v16, %v167_v8  ;;  %v1206_v10 = vpop.permute.xlu1 %1205  ;;  %v1543_v35 = vadd.f32 %v318_v30, %v166_v26  ;;  %v263_v41 = vpop.permute.xlu0 %262  ;;  %v55_v8 = vand.u32 2147483647, %v1351_v24  ;;  %v168_v30 = vadd.f32 %v160_v34, %v69_v21 }
  0xb0   :  { %v1208_v40 = vunpack.i.h.bf16 %v1206_v10  ;;  %v1207_v29 = vunpack.i.l.bf16 %v1206_v10  ;;  %v279_v48 = vsel %vm276_vm2, %v1421_v47, %v263_v41  ;;  %v54_v47 = vand.u32 2147483647, %v1320_v13 }
  0xb1   :  { %v295_v43 = vsub.f32 %v1292_v3, %v279_v48  ;;  %666 = vrot.lane.b32.xlu2 %v1320_v13, %s1257_s28  ;;  %v145_v10 = vand.u32 2147483647, %v137_v44 }
  0xb2   :  { %v284_v37 = vsel %vm276_vm2, %v1452_v60, %v1208_v40  ;;  %v280_v54 = vsel %vm276_vm2, %v263_v41, %v1207_v29  ;;  %v169_v29 = vadd.f32 %v161_v36, %v70_v20  ;;  %v146_v41 = vand.u32 2147483647, %v138_v55 }
  0xb3   :  { %v300_v11 = vsub.f32 %v1347_v22, %v284_v37  ;;  %v296_v45 = vsub.f32 %v1322_v14, %v280_v54  ;;  %v303_v2 = vand.u32 2147483647, %v295_v43  ;;  %v1567_v12 = vpop.permute.xlu2 %352  ;;  %v73_v43 = vmul.f32 %v61_v31, %v56_v38 }
  0xb4   :  { %v71_v31 = vmul.f32 %v59_v17, %v54_v47  ;;  %v72_v55 = vmul.f32 %v60_v18, %v55_v8 }
  0xb5   :  { %v308_v16 = vand.u32 2147483647, %v300_v11  ;;  %v304_v26 = vand.u32 2147483647, %v296_v45  ;;  %1230 = vrot.lane.b32.xlu1 %v1249_v5, %s1257_s28  ;;  %v320_v40 = vmul.f32 %v312_v53, %v303_v2  ;;  %662 = vrot.lane.b32.xlu0 %v1322_v14, %s1257_s28  ;;  %v164_v11 = vmul.f32 %v152_v32, %v147_v61 }
  0xb6   :  { %v162_v32 = vmul.f32 %v150_v25, %v145_v10 }
  0xb7   :  { %v325_v48 = vmul.f32 %v313_v56, %v308_v16  ;;  %v321_v37 = vmul.f32 %v313_v56, %v304_v26  ;;  %v271_v54 = vpop.permute.xlu1 %270  ;;  %v1573_v1 = vadd.f32 %v320_v40, %v168_v30  ;;  %v269_v33 = vpop.permute.xlu0 %268  ;;  %v163_v56 = vmul.f32 %v151_v19, %v146_v41 }
  0xb8   :  { %v283_v21 = vsel %vm276_vm2, %v271_v54, %v1452_v60  ;;  %v281_v36 = vsel %vm276_vm2, %v1435_v52, %v269_v33  ;;  %v282_v38 = vsel %vm276_vm2, %v269_v33, %v271_v54  ;;  %v214_v52 = vsub.f32 %v1324_v15, %v1424_v49 }
  0xb9   :  { %v1577_v34 = vadd.f32 %v325_v48, %v173_v46  ;;  %v1579_v44 = vadd.f32 %v321_v37, %v169_v29  ;;  %v299_v20 = vsub.f32 %v1349_v23, %v283_v21  ;;  %v297_v60 = vsub.f32 %v1320_v13, %v281_v36  ;;  %736 = vrot.lane.b32.xlu2 %v1298_v6, %s1258_s29 }
  0xba   :  { %v298_v61 = vsub.f32 %v1351_v24, %v282_v38  ;;  %v172_v25 = vadd.f32 %v164_v11, %v73_v43  ;;  %v170_v19 = vadd.f32 %v162_v32, %v71_v31  ;;  %v213_v49 = vsub.f32 %v1298_v6, %v1427_v51 }
  0xbb   :  { %v307_v45 = vand.u32 2147483647, %v299_v20  ;;  %v305_v17 = vand.u32 2147483647, %v297_v60  ;;  %v1612_v2 = vpop.permute.xlu2 %420  ;;  %v171_v8 = vadd.f32 %v163_v56, %v72_v55  ;;  %v231_v46 = vperm.slane %v1602_v62, 1 }
  0xbc   :  { %v306_v63 = vand.u32 2147483647, %v298_v61  ;;  %v220_v20 = vsub.f32 %v1347_v22, %v1441_v58  ;;  %v215_v36 = vsub.f32 %v1292_v3, %v1438_v57  ;;  %v216_v57 = vsub.f32 %v1322_v14, %v1444_v59 }
  0xbd   :  { %v324_v18 = vmul.f32 %v312_v53, %v307_v45  ;;  %670 = vrot.lane.b32.xlu1 %v1349_v23, %s1257_s28  ;;  %v322_v47 = vmul.f32 %v310_v50, %v305_v17  ;;  %668 = vrot.lane.b32.xlu0 %v1351_v24, %s1257_s28  ;;  %v1617_v53 = vld [vmem:[%s2346_s2 + $0x3] ss:$8 sm:$0xf]  ;;  %v222_v50 = vand.u32 2147483647, %v214_v52  ;;  %v232_v56 = vperm.slane %v1602_v62, 2 }
  0xbe   :  { %v323_v26 = vmul.f32 %v311_v42, %v306_v63  ;;  %v391_v41 = vperm.slane %v1617_v53, 1  ;;  %v221_v42 = vand.u32 2147483647, %v213_v49  ;;  %v390_v54 = vperm.slane %v1617_v53, 0 }
  0xbf   :  { %v1619_v16 = vadd.f32 %v324_v18, %v172_v25  ;;  %v339_v51 = vpop.permute.xlu1 %338  ;;  %v1624_v30 = vadd.f32 %v322_v47, %v170_v19  ;;  %v337_v40 = vpop.permute.xlu0 %336  ;;  %v239_v33 = vmul.f32 %v231_v46, %v222_v50  ;;  %v228_v25 = vand.u32 2147483647, %v220_v20 }
  0xc0   :  { %v358_v10 = vsel %vm356_vm3, %v339_v51, %v1491_v27  ;;  %v1628_v29 = vadd.f32 %v323_v26, %v171_v8  ;;  %v357_v37 = vsel %vm356_vm3, %v337_v40, %v339_v51  ;;  %v238_v32 = vmul.f32 %v230_v28, %v221_v42 }
  0xc1   :  { %v374_v48 = vsub.f32 %v1324_v15, %v358_v10  ;;  %v373_v43 = vsub.f32 %v1298_v6, %v357_v37  ;;  %742 = vrot.lane.b32.xlu2 %v1322_v14, %s1258_s29  ;;  %v233_v18 = vperm.slane %v1602_v62, 3  ;;  %v223_v63 = vand.u32 2147483647, %v215_v36 }
  0xc2   :  { %v392_v49 = vperm.slane %v1617_v53, 2  ;;  %v224_v26 = vand.u32 2147483647, %v216_v57  ;;  %v393_v50 = vperm.slane %v1617_v53, 3  ;;  %v219_v40 = vsub.f32 %v1349_v23, %v1465_v0 }
  0xc3   :  { %v382_v11 = vand.u32 2147483647, %v374_v48  ;;  %v381_v21 = vand.u32 2147483647, %v373_v43  ;;  %v1654_v60 = vpop.permute.xlu2 %426  ;;  %v240_v43 = vmul.f32 %v232_v56, %v223_v63 }
  0xc5   :  { %v399_v31 = vmul.f32 %v391_v41, %v382_v11  ;;  %740 = vrot.lane.b32.xlu1 %v1292_v3, %s1258_s29  ;;  %v398_v38 = vmul.f32 %v390_v54, %v381_v21  ;;  %738 = vrot.lane.b32.xlu0 %v1324_v15, %s1258_s29  ;;  %v218_v11 = vsub.f32 %v1351_v24, %v1472_v7 }
  0xc7   :  { %v1658_v58 = vadd.f32 %v399_v31, %v239_v33  ;;  %v1211_v55 = vpop.permute.xlu1 %1210  ;;  %v1661_v45 = vadd.f32 %v398_v38, %v238_v32  ;;  %v343_v17 = vpop.permute.xlu0 %342  ;;  %v241_v33 = vmul.f32 %v233_v18, %v224_v26  ;;  %v227_v32 = vand.u32 2147483647, %v219_v40 }
  0xc8   :  { %v1213_v61 = vunpack.i.h.bf16 %v1211_v55  ;;  %v1212_v52 = vunpack.i.l.bf16 %v1211_v55  ;;  %v359_v19 = vsel %vm356_vm3, %v1491_v27, %v343_v17  ;;  %v217_v27 = vsub.f32 %v1320_v13, %v1469_v4 }
  0xc9   :  { %v375_v8 = vsub.f32 %v1292_v3, %v359_v19  ;;  %820 = vrot.lane.b32.xlu2 %v1292_v3, %s1259_s7  ;;  %v245_v4 = vmul.f32 %v233_v18, %v228_v25  ;;  %v226_v18 = vand.u32 2147483647, %v218_v11  ;;  %v244_v26 = vmul.f32 %v232_v56, %v227_v32 }
  0xca   :  { %v364_v59 = vsel %vm356_vm3, %v1567_v12, %v1213_v61  ;;  %v360_v47 = vsel %vm356_vm3, %v343_v17, %v1212_v52  ;;  %v225_v38 = vand.u32 2147483647, %v217_v27 }
  0xcb   :  { %v380_v51 = vsub.f32 %v1347_v22, %v364_v59  ;;  %v376_v10 = vsub.f32 %v1322_v14, %v360_v47  ;;  %v383_v48 = vand.u32 2147483647, %v375_v8  ;;  %v1686_v0 = vpop.permute.xlu2 %432 }
  0xcd   :  { %v388_v37 = vand.u32 2147483647, %v380_v51  ;;  %v384_v42 = vand.u32 2147483647, %v376_v10  ;;  %818 = vrot.lane.b32.xlu1 %v1324_v15, %s1259_s7  ;;  %v400_v21 = vmul.f32 %v392_v49, %v383_v48  ;;  %816 = vrot.lane.b32.xlu0 %v1298_v6, %s1259_s7 }
  0xcf   :  { %v405_v20 = vmul.f32 %v393_v50, %v388_v37  ;;  %v401_v36 = vmul.f32 %v393_v50, %v384_v42  ;;  %v351_v31 = vpop.permute.xlu1 %350  ;;  %v1688_v57 = vadd.f32 %v400_v21, %v240_v43  ;;  %v349_v61 = vpop.permute.xlu0 %348  ;;  %v243_v50 = vmul.f32 %v231_v46, %v226_v18 }
  0xd0   :  { %v363_v55 = vsel %vm356_vm3, %v351_v31, %v1567_v12  ;;  %v361_v17 = vsel %vm356_vm3, %v1534_v9, %v349_v61  ;;  %v362_v25 = vsel %vm356_vm3, %v349_v61, %v351_v31  ;;  %v242_v9 = vmul.f32 %v230_v28, %v225_v38 }
  0xd1   :  { %v1692_v7 = vadd.f32 %v401_v36, %v241_v33  ;;  %v379_v52 = vsub.f32 %v1349_v23, %v363_v55  ;;  %v377_v63 = vsub.f32 %v1320_v13, %v361_v17  ;;  %v378_v19 = vsub.f32 %v1351_v24, %v362_v25  ;;  %900 = vrot.lane.b32.xlu2 %v1292_v3, %s1260_s8 }
  0xd2   :  { %v1700_v59 = vadd.f32 %v405_v20, %v245_v4 }
  0xd3   :  { %v387_v47 = vand.u32 2147483647, %v379_v52  ;;  %v385_v8 = vand.u32 2147483647, %v377_v63  ;;  %v386_v12 = vand.u32 2147483647, %v378_v19  ;;  %v1716_v56 = vpop.permute.xlu2 %500 }
  0xd5   :  { %v404_v51 = vmul.f32 %v392_v49, %v387_v47  ;;  %898 = vrot.lane.b32.xlu1 %v1324_v15, %s1260_s8  ;;  %v402_v10 = vmul.f32 %v390_v54, %v385_v8  ;;  %v403_v40 = vmul.f32 %v391_v41, %v386_v12  ;;  %896 = vrot.lane.b32.xlu0 %v1298_v6, %s1260_s8  ;;  %v1721_v49 = vld [vmem:[%s2346_s2 + $0x4] ss:$8 sm:$0xf] }
  0xd6   :  { %v471_v54 = vperm.slane %v1721_v49, 1  ;;  %v470_v42 = vperm.slane %v1721_v49, 0  ;;  %v472_v25 = vperm.slane %v1721_v49, 2 }
  0xd7   :  { %v1723_v28 = vadd.f32 %v404_v51, %v244_v26  ;;  %v419_v62 = vpop.permute.xlu1 %418  ;;  %v1725_v46 = vadd.f32 %v402_v10, %v242_v9  ;;  %v1727_v27 = vadd.f32 %v403_v40, %v243_v50  ;;  %v417_v41 = vpop.permute.xlu0 %416 }
  0xd8   :  { %v438_v53 = vsel %vm436_vm4, %v419_v62, %v1612_v2  ;;  %v437_v37 = vsel %vm436_vm4, %v417_v41, %v419_v62 }
  0xd9   :  { %v454_v48 = vsub.f32 %v1324_v15, %v438_v53  ;;  %v453_v43 = vsub.f32 %v1298_v6, %v437_v37  ;;  %902 = vrot.lane.b32.xlu2 %v1322_v14, %s1260_s8 }
  0xdb   :  { %v462_v11 = vand.u32 2147483647, %v454_v48  ;;  %v461_v21 = vand.u32 2147483647, %v453_v43  ;;  %v1742_v20 = vpop.permute.xlu2 %506 }
  0xdd   :  { %v479_v4 = vmul.f32 %v471_v54, %v462_v11  ;;  %822 = vrot.lane.b32.xlu1 %v1322_v14, %s1259_s7  ;;  %v478_v33 = vmul.f32 %v470_v42, %v461_v21  ;;  %1235 = vrot.lane.b32.xlu0 %v1249_v5, %s1258_s29 }
  0xdf   :  { %v1745_v36 = vadd.f32 %v479_v4, %v1539_v39  ;;  %v1216_v31 = vpop.permute.xlu1 %1215  ;;  %v1748_v32 = vadd.f32 %v478_v33, %v1543_v35  ;;  %v423_v61 = vpop.permute.xlu0 %422  ;;  %v473_v35 = vperm.slane %v1721_v49, 3 }
  0xe0   :  { %v1218_v38 = vunpack.i.h.bf16 %v1216_v31  ;;  %v1217_v55 = vunpack.i.l.bf16 %v1216_v31  ;;  %v439_v52 = vsel %vm436_vm4, %v1612_v2, %v423_v61 }
  0xe1   :  { %v455_v39 = vsub.f32 %v1292_v3, %v439_v52  ;;  %980 = vrot.lane.b32.xlu2 %v1292_v3, %s1261_s11 }
  0xe2   :  { %v444_v17 = vsel %vm436_vm4, %v1686_v0, %v1218_v38  ;;  %v440_v18 = vsel %vm436_vm4, %v423_v61, %v1217_v55 }
  0xe3   :  { %v460_v63 = vsub.f32 %v1347_v22, %v444_v17  ;;  %v456_v19 = vsub.f32 %v1322_v14, %v440_v18  ;;  %v463_v47 = vand.u32 2147483647, %v455_v39  ;;  %v1766_v26 = vpop.permute.xlu2 %512 }
  0xe5   :  { %v468_v2 = vand.u32 2147483647, %v460_v63  ;;  %v464_v8 = vand.u32 2147483647, %v456_v19  ;;  %978 = vrot.lane.b32.xlu1 %v1324_v15, %s1261_s11  ;;  %v480_v12 = vmul.f32 %v472_v25, %v463_v47  ;;  %976 = vrot.lane.b32.xlu0 %v1298_v6, %s1261_s11 }
  0xe7   :  { %v485_v51 = vmul.f32 %v473_v35, %v468_v2  ;;  %v481_v9 = vmul.f32 %v473_v35, %v464_v8  ;;  %v431_v50 = vpop.permute.xlu1 %430  ;;  %v1769_v10 = vadd.f32 %v480_v12, %v1573_v1  ;;  %v429_v49 = vpop.permute.xlu0 %428 }
  0xe8   :  { %v443_v40 = vsel %vm436_vm4, %v431_v50, %v1686_v0  ;;  %v441_v41 = vsel %vm436_vm4, %v1654_v60, %v429_v49  ;;  %v442_v48 = vsel %vm436_vm4, %v429_v49, %v431_v50 }
  0xe9   :  { %v1774_v62 = vadd.f32 %v481_v9, %v1579_v44  ;;  %v459_v53 = vsub.f32 %v1349_v23, %v443_v40  ;;  %v457_v37 = vsub.f32 %v1320_v13, %v441_v41  ;;  %v458_v43 = vsub.f32 %v1351_v24, %v442_v48  ;;  %1060 = vrot.lane.b32.xlu2 %v1292_v3, %s1262_s12 }
  0xea   :  { %v1783_v1 = vadd.f32 %v485_v51, %v1577_v34  ;;  %v1796_v34 = vld [vmem:[%s2346_s2 + $0x5] ss:$8 sm:$0xf] }
  0xeb   :  { %v467_v11 = vand.u32 2147483647, %v459_v53  ;;  %v465_v0 = vand.u32 2147483647, %v457_v37  ;;  %v466_v21 = vand.u32 2147483647, %v458_v43  ;;  %v1791_v33 = vpop.permute.xlu2 %580 }
  0xec   :  { %v551_v52 = vperm.slane %v1796_v34, 1  ;;  %v552_v9 = vperm.slane %v1796_v34, 2 }
  0xed   :  { %v484_v44 = vmul.f32 %v472_v25, %v467_v11  ;;  %1058 = vrot.lane.b32.xlu1 %v1324_v15, %s1262_s12  ;;  %v482_v60 = vmul.f32 %v470_v42, %v465_v0  ;;  %v483_v4 = vmul.f32 %v471_v54, %v466_v21  ;;  %1056 = vrot.lane.b32.xlu0 %v1298_v6, %s1262_s12 }
  0xef   :  { %v1799_v31 = vadd.f32 %v484_v44, %v1619_v16  ;;  %v499_v38 = vpop.permute.xlu1 %498  ;;  %v1802_v55 = vadd.f32 %v482_v60, %v1624_v30  ;;  %v1805_v42 = vadd.f32 %v483_v4, %v1628_v29  ;;  %v497_v61 = vpop.permute.xlu0 %496  ;;  %v550_v16 = vperm.slane %v1796_v34, 0 }
  0xf0   :  { %v518_v54 = vsel %vm516_vm5, %v499_v38, %v1716_v56  ;;  %v517_v25 = vsel %vm516_vm5, %v497_v61, %v499_v38 }
  0xf1   :  { %v534_v17 = vsub.f32 %v1324_v15, %v518_v54  ;;  %v533_v18 = vsub.f32 %v1298_v6, %v517_v25  ;;  %1240 = vrot.lane.b32.xlu2 %v1249_v5, %s1259_s7 }
  0xf3   :  { %v542_v39 = vand.u32 2147483647, %v534_v17  ;;  %v541_v30 = vand.u32 2147483647, %v533_v18  ;;  %v1820_v35 = vpop.permute.xlu2 %586 }
  0xf5   :  { %v559_v29 = vmul.f32 %v551_v52, %v542_v39  ;;  %748 = vrot.lane.b32.xlu1 %v1351_v24, %s1258_s29  ;;  %v558_v63 = vmul.f32 %v550_v16, %v541_v30  ;;  %746 = vrot.lane.b32.xlu0 %v1320_v13, %s1258_s29 }
  0xf7   :  { %v1823_v19 = vadd.f32 %v559_v29, %v1658_v58  ;;  %v1221_v47 = vpop.permute.xlu1 %1220  ;;  %v1826_v2 = vadd.f32 %v558_v63, %v1661_v45  ;;  %v503_v51 = vpop.permute.xlu0 %502  ;;  %v553_v45 = vperm.slane %v1796_v34, 3 }
  0xf8   :  { %v1223_v8 = vunpack.i.h.bf16 %v1221_v47  ;;  %v1222_v12 = vunpack.i.l.bf16 %v1221_v47  ;;  %v519_v50 = vsel %vm516_vm5, %v1716_v56, %v503_v51 }
  0xf9   :  { %v535_v58 = vsub.f32 %v1292_v3, %v519_v50  ;;  %1062 = vrot.lane.b32.xlu2 %v1322_v14, %s1262_s12 }
  0xfa   :  { %v524_v40 = vsel %vm516_vm5, %v1766_v26, %v1223_v8  ;;  %v520_v49 = vsel %vm516_vm5, %v503_v51, %v1222_v12 }
  0xfb   :  { %v540_v53 = vsub.f32 %v1347_v22, %v524_v40  ;;  %v536_v41 = vsub.f32 %v1322_v14, %v520_v49  ;;  %v543_v48 = vand.u32 2147483647, %v535_v58  ;;  %v1844_v11 = vpop.permute.xlu2 %592 }
  0xfd   :  { %v548_v37 = vand.u32 2147483647, %v540_v53  ;;  %v544_v43 = vand.u32 2147483647, %v536_v41  ;;  %982 = vrot.lane.b32.xlu1 %v1322_v14, %s1261_s11  ;;  %v560_v56 = vmul.f32 %v552_v9, %v543_v48  ;;  %1245 = vrot.lane.b32.xlu0 %v1249_v5, %s1260_s8 }
  0xff   :  { %v565_v0 = vmul.f32 %v553_v45, %v548_v37  ;;  %v561_v21 = vmul.f32 %v553_v45, %v544_v43  ;;  %v511_v44 = vpop.permute.xlu1 %510  ;;  %v1847_v60 = vadd.f32 %v560_v56, %v1688_v57  ;;  %v509_v34 = vpop.permute.xlu0 %508 }
 0x100   :  { %v523_v4 = vsel %vm516_vm5, %v511_v44, %v1766_v26  ;;  %v521_v61 = vsel %vm516_vm5, %v1742_v20, %v509_v34  ;;  %v522_v17 = vsel %vm516_vm5, %v509_v34, %v511_v44 }
 0x101   :  { %v1852_v38 = vadd.f32 %v561_v21, %v1692_v7  ;;  %v539_v54 = vsub.f32 %v1349_v23, %v523_v4  ;;  %v537_v25 = vsub.f32 %v1320_v13, %v521_v61  ;;  %v538_v18 = vsub.f32 %v1351_v24, %v522_v17  ;;  %828 = vrot.lane.b32.xlu2 %v1351_v24, %s1259_s7 }
 0x102   :  { %v1861_v57 = vadd.f32 %v565_v0, %v1700_v59  ;;  %v1874_v59 = vld [vmem:[%s2346_s2 + $0x6] ss:$8 sm:$0xf] }
 0x103   :  { %v547_v39 = vand.u32 2147483647, %v539_v54  ;;  %v545_v26 = vand.u32 2147483647, %v537_v25  ;;  %v546_v30 = vand.u32 2147483647, %v538_v18  ;;  %v1869_v63 = vpop.permute.xlu2 %660 }
 0x104   :  { %v632_v4 = vperm.slane %v1874_v59, 2 }
 0x105   :  { %v564_v7 = vmul.f32 %v552_v9, %v547_v39  ;;  %826 = vrot.lane.b32.xlu1 %v1320_v13, %s1259_s7  ;;  %v562_v20 = vmul.f32 %v550_v16, %v545_v26  ;;  %v563_v29 = vmul.f32 %v551_v52, %v546_v30  ;;  %750 = vrot.lane.b32.xlu0 %v1349_v23, %s1258_s29  ;;  %v631_v9 = vperm.slane %v1874_v59, 1 }
 0x107   :  { %v1877_v47 = vadd.f32 %v564_v7, %v1723_v28  ;;  %v579_v8 = vpop.permute.xlu1 %578  ;;  %v1880_v12 = vadd.f32 %v562_v20, %v1725_v46  ;;  %v1883_v16 = vadd.f32 %v563_v29, %v1727_v27  ;;  %v577_v51 = vpop.permute.xlu0 %576  ;;  %v630_v28 = vperm.slane %v1874_v59, 0 }
 0x108   :  { %v598_v52 = vsel %vm596_vm6, %v579_v8, %v1791_v33  ;;  %v597_v40 = vsel %vm596_vm6, %v577_v51, %v579_v8 }
 0x109   :  { %v614_v50 = vsub.f32 %v1324_v15, %v598_v52  ;;  %v613_v49 = vsub.f32 %v1298_v6, %v597_v40  ;;  %984 = vrot.lane.b32.xlu2 %v1249_v5, %s1261_s11 }
 0x10b   :  { %v622_v58 = vand.u32 2147483647, %v614_v50  ;;  %v621_v46 = vand.u32 2147483647, %v613_v49  ;;  %v1898_v45 = vpop.permute.xlu2 %666 }
 0x10d   :  { %v639_v27 = vmul.f32 %v631_v9, %v622_v58  ;;  %908 = vrot.lane.b32.xlu1 %v1351_v24, %s1260_s8  ;;  %v638_v53 = vmul.f32 %v630_v28, %v621_v46  ;;  %906 = vrot.lane.b32.xlu0 %v1320_v13, %s1260_s8 }
 0x10f   :  { %v1901_v41 = vadd.f32 %v639_v27, %v1745_v36  ;;  %v1226_v48 = vpop.permute.xlu1 %1225  ;;  %v1904_v37 = vadd.f32 %v638_v53, %v1748_v32  ;;  %v583_v0 = vpop.permute.xlu0 %582  ;;  %v633_v32 = vperm.slane %v1874_v59, 3 }
 0x110   :  { %v1228_v43 = vunpack.i.h.bf16 %v1226_v48  ;;  %v1227_v56 = vunpack.i.l.bf16 %v1226_v48  ;;  %v599_v21 = vsel %vm596_vm6, %v1791_v33, %v583_v0 }
 0x111   :  { %v615_v36 = vsub.f32 %v1292_v3, %v599_v21  ;;  %752 = vrot.lane.b32.xlu2 %v1347_v22, %s1258_s29 }
 0x112   :  { %v604_v44 = vsel %vm596_vm6, %v1844_v11, %v1228_v43  ;;  %v600_v34 = vsel %vm596_vm6, %v583_v0, %v1227_v56 }
 0x113   :  { %v620_v54 = vsub.f32 %v1347_v22, %v604_v44  ;;  %v616_v61 = vsub.f32 %v1322_v14, %v600_v34  ;;  %v623_v17 = vand.u32 2147483647, %v615_v36  ;;  %v1922_v39 = vpop.permute.xlu2 %736 }
 0x115   :  { %v628_v33 = vand.u32 2147483647, %v620_v54  ;;  %v624_v25 = vand.u32 2147483647, %v616_v61  ;;  %672 = vrot.lane.b32.xlu1 %v1347_v22, %s1257_s28  ;;  %v640_v18 = vmul.f32 %v632_v4, %v623_v17  ;;  %1064 = vrot.lane.b32.xlu0 %v1249_v5, %s1262_s12 }
 0x117   :  { %v645_v26 = vmul.f32 %v633_v32, %v628_v33  ;;  %v641_v30 = vmul.f32 %v633_v32, %v624_v25  ;;  %v591_v7 = vpop.permute.xlu1 %590  ;;  %v1925_v20 = vadd.f32 %v640_v18, %v1769_v10  ;;  %v589_v59 = vpop.permute.xlu0 %588 }
 0x118   :  { %v603_v29 = vsel %vm596_vm6, %v591_v7, %v1844_v11  ;;  %v601_v51 = vsel %vm596_vm6, %v1820_v35, %v589_v59  ;;  %v602_v50 = vsel %vm596_vm6, %v589_v59, %v591_v7 }
 0x119   :  { %v1930_v8 = vadd.f32 %v641_v30, %v1774_v62  ;;  %v619_v52 = vsub.f32 %v1349_v23, %v603_v29  ;;  %v617_v40 = vsub.f32 %v1320_v13, %v601_v51  ;;  %v618_v49 = vsub.f32 %v1351_v24, %v602_v50  ;;  %986 = vrot.lane.b32.xlu2 %v1320_v13, %s1261_s11 }
 0x11a   :  { %v1939_v58 = vadd.f32 %v645_v26, %v1783_v1  ;;  %v1952_v1 = vld [vmem:[%s2346_s2 + $0x7] ss:$8 sm:$0xf] }
 0x11b   :  { %v627_v10 = vand.u32 2147483647, %v619_v52  ;;  %v625_v11 = vand.u32 2147483647, %v617_v40  ;;  %v626_v46 = vand.u32 2147483647, %v618_v49  ;;  %v1947_v53 = vpop.permute.xlu2 %742 }
 0x11c   :  { %v711_v21 = vperm.slane %v1952_v1, 1  ;;  %v712_v30 = vperm.slane %v1952_v1, 2 }
 0x11d   :  { %v644_v62 = vmul.f32 %v632_v4, %v627_v10  ;;  %910 = vrot.lane.b32.xlu1 %v1349_v23, %s1260_s8  ;;  %v642_v35 = vmul.f32 %v630_v28, %v625_v11  ;;  %v643_v27 = vmul.f32 %v631_v9, %v626_v46  ;;  %830 = vrot.lane.b32.xlu0 %v1349_v23, %s1259_s7 }
 0x11f   :  { %v1955_v48 = vadd.f32 %v644_v62, %v1799_v31  ;;  %v659_v43 = vpop.permute.xlu1 %658  ;;  %v1958_v56 = vadd.f32 %v642_v35, %v1802_v55  ;;  %v1961_v28 = vadd.f32 %v643_v27, %v1805_v42  ;;  %v657_v0 = vpop.permute.xlu0 %656  ;;  %v710_v31 = vperm.slane %v1952_v1, 0 }
 0x120   :  { %v678_v9 = vsel %vm676_vm7, %v659_v43, %v1869_v63  ;;  %v677_v4 = vsel %vm676_vm7, %v657_v0, %v659_v43  ;;  %v2023_v43 = vld [vmem:[%s2346_s2 + $0x22] ss:$8 sm:$0xf] }
 0x121   :  { %v694_v44 = vsub.f32 %v1324_v15, %v678_v9  ;;  %v693_v34 = vsub.f32 %v1298_v6, %v677_v4  ;;  %1068 = vrot.lane.b32.xlu2 %v1351_v24, %s1262_s12  ;;  %v2349_v4 = vperm.slane %v2023_v43, 2 }
 0x123   :  { %v702_v36 = vand.u32 2147483647, %v694_v44  ;;  %v701_v55 = vand.u32 2147483647, %v693_v34  ;;  %v1976_v32 = vpop.permute.xlu2 %820 }
 0x125   :  { %v719_v42 = vmul.f32 %v711_v21, %v702_v36  ;;  %1066 = vrot.lane.b32.xlu1 %v1320_v13, %s1262_s12  ;;  %v718_v54 = vmul.f32 %v710_v31, %v701_v55  ;;  %988 = vrot.lane.b32.xlu0 %v1351_v24, %s1261_s11 }
 0x127   :  { %v1979_v61 = vadd.f32 %v719_v42, %v1823_v19  ;;  %v1981_v17 = vpop.permute.xlu1 %1230  ;;  %v1984_v33 = vadd.f32 %v718_v54, %v1826_v2  ;;  %v663_v18 = vpop.permute.xlu0 %662  ;;  %v713_v19 = vperm.slane %v1952_v1, 3 }
 0x128   :  { %v1232_v25 = vunpack.i.l.bf16 %v1981_v17  ;;  %v679_v26 = vsel %vm676_vm7, %v1869_v63, %v663_v18 }
 0x129   :  { %v695_v29 = vsub.f32 %v1292_v3, %v679_v26  ;;  %990 = vrot.lane.b32.xlu2 %v1349_v23, %s1261_s11 }
 0x12a   :  { %v680_v7 = vsel %vm676_vm7, %v663_v18, %v1232_v25 }
 0x12b   :  { %v696_v59 = vsub.f32 %v1322_v14, %v680_v7  ;;  %v703_v52 = vand.u32 2147483647, %v695_v29  ;;  %v2002_v51 = vpop.permute.xlu2 %900 }
 0x12d   :  { %v704_v2 = vand.u32 2147483647, %v696_v59  ;;  %912 = vrot.lane.b32.xlu1 %v1347_v22, %s1260_s8  ;;  %v720_v63 = vmul.f32 %v712_v30, %v703_v52  ;;  %832 = vrot.lane.b32.xlu0 %v1347_v22, %s1259_s7 }
 0x12f   :  { %v721_v50 = vmul.f32 %v713_v19, %v704_v2  ;;  %v2006_v40 = vpop.permute.xlu1 %670  ;;  %v2009_v49 = vadd.f32 %v720_v63, %v1847_v60  ;;  %v669_v10 = vpop.permute.xlu0 %668  ;;  %v2028_v60 = vld [vmem:[%s2346_s2 + $0x20] ss:$8 sm:$0xf] }
 0x130   :  { %v681_v46 = vsel %vm676_vm7, %v1898_v45, %v669_v10  ;;  %v682_v62 = vsel %vm676_vm7, %v669_v10, %v2006_v40  ;;  %v792_v36 = vperm.slane %v2028_v60, 2  ;;  %v790_v26 = vperm.slane %v2028_v60, 0 }
 0x131   :  { %v2012_v11 = vadd.f32 %v721_v50, %v1852_v38  ;;  %v697_v35 = vsub.f32 %v1320_v13, %v681_v46  ;;  %v698_v27 = vsub.f32 %v1351_v24, %v682_v62  ;;  %1072 = vrot.lane.b32.xlu2 %v1347_v22, %s1262_s12  ;;  %v791_v59 = vperm.slane %v2028_v60, 1 }
 0x133   :  { %v705_v38 = vand.u32 2147483647, %v697_v35  ;;  %v706_v9 = vand.u32 2147483647, %v698_v27  ;;  %v2036_v44 = vpop.permute.xlu2 %902 }
 0x134   :  { %v919_v34 = vsel %vm916_vm8, %v2002_v51, %v2036_v44  ;;  %v2077_v27 = vld [vmem:[%s2346_s2 + $0x21] ss:$8 sm:$0xf] }
 0x135   :  { %992 = vrot.lane.b32.xlu1 %v1347_v22, %s1261_s11  ;;  %v722_v45 = vmul.f32 %v710_v31, %v705_v38  ;;  %v723_v0 = vmul.f32 %v711_v21, %v706_v9  ;;  %1070 = vrot.lane.b32.xlu0 %v1349_v23, %s1262_s12  ;;  %v935_v21 = vsub.f32 %v1292_v3, %v919_v34 }
 0x137   :  { %v741_v55 = vpop.permute.xlu1 %740  ;;  %v2044_v42 = vadd.f32 %v722_v45, %v1880_v12  ;;  %v2047_v31 = vadd.f32 %v723_v0, %v1883_v16  ;;  %v739_v25 = vpop.permute.xlu0 %738  ;;  %v943_v12 = vand.u32 2147483647, %v935_v21 }
 0x138   :  { %v759_v54 = vsel %vm756_vm9, %v741_v55, %v1947_v53  ;;  %v757_v7 = vsel %vm756_vm9, %v1922_v39, %v739_v25  ;;  %v758_v29 = vsel %vm756_vm9, %v739_v25, %v741_v55 }
 0x139   :  { %v775_v18 = vsub.f32 %v1292_v3, %v759_v54  ;;  %v773_v16 = vsub.f32 %v1298_v6, %v757_v7  ;;  %v774_v52 = vsub.f32 %v1324_v15, %v758_v29  ;;  %v960_v10 = vmul.f32 %v2349_v4, %v943_v12 }
 0x13b   :  { %v783_v2 = vand.u32 2147483647, %v775_v18  ;;  %v781_v63 = vand.u32 2147483647, %v773_v16  ;;  %v782_v50 = vand.u32 2147483647, %v774_v52  ;;  %v2072_v35 = vpop.permute.xlu2 %980 }
 0x13c   :  { %v870_v18 = vperm.slane %v2077_v27, 0 }
 0x13d   :  { %v800_v46 = vmul.f32 %v792_v36, %v783_v2  ;;  %1074 = vrot.lane.b32.xlu1 %v1249_v5, %s1262_s12  ;;  %v798_v39 = vmul.f32 %v790_v26, %v781_v63  ;;  %v799_v62 = vmul.f32 %v791_v59, %v782_v50  ;;  %994 = vrot.lane.b32.xlu0 %v1249_v5, %s1261_s11  ;;  %v2351_v5 = vperm.slane %v2077_v27, 1 }
 0x13f   :  { %v808_v38 = vadd.f32 %v800_v46, %v1925_v20  ;;  %v819_v9 = vpop.permute.xlu1 %818  ;;  %v806_v45 = vadd.f32 %v798_v39, %v1904_v37  ;;  %v807_v0 = vadd.f32 %v799_v62, %v1901_v41  ;;  %v817_v55 = vpop.permute.xlu0 %816  ;;  %v950_v62 = vperm.slane %v2023_v43, 0 }
 0x140   :  { %v838_v34 = vsel %vm836_vm10, %v819_v9, %v1976_v32  ;;  %v837_v54 = vsel %vm836_vm10, %v817_v55, %v819_v9 }
 0x141   :  { %v854_v21 = vsub.f32 %v1324_v15, %v838_v34  ;;  %v2087_v25 = vadd.f32 %v960_v10, %v808_v38  ;;  %v853_v20 = vsub.f32 %v1298_v6, %v837_v54  ;;  %v2352_v10 = vperm.slane %v2023_v43, 1 }
 0x143   :  { %v862_v7 = vand.u32 2147483647, %v854_v21  ;;  %v861_v37 = vand.u32 2147483647, %v853_v20  ;;  %v2095_v12 = vpop.permute.xlu2 %1060 }
 0x145   :  { %v879_v41 = vmul.f32 %v2351_v5, %v862_v7  ;;  %v878_v29 = vmul.f32 %v870_v18, %v861_v37 }
 0x147   :  { %v2098_v16 = vadd.f32 %v879_v41, %v1979_v61  ;;  %v899_v52 = vpop.permute.xlu1 %898  ;;  %v2101_v2 = vadd.f32 %v878_v29, %v1984_v33  ;;  %v897_v50 = vpop.permute.xlu0 %896  ;;  %v2350_v41 = vperm.slane %v2077_v27, 2 }
 0x148   :  { %v918_v63 = vsel %vm916_vm8, %v899_v52, %v2002_v51  ;;  %v917_v39 = vsel %vm916_vm8, %v897_v50, %v899_v52 }
 0x149   :  { %v934_v46 = vsub.f32 %v1324_v15, %v918_v63  ;;  %v933_v38 = vsub.f32 %v1298_v6, %v917_v39 }
 0x14b   :  { %v942_v61 = vand.u32 2147483647, %v934_v46  ;;  %v941_v9 = vand.u32 2147483647, %v933_v38  ;;  %v2114_v51 = vpop.permute.xlu2 %1240 }
 0x14c   :  { %v1242_v21 = vunpack.i.l.bf16 %v2114_v51 }
 0x14d   :  { %v959_v33 = vmul.f32 %v2352_v10, %v942_v61  ;;  %v958_v34 = vmul.f32 %v950_v62, %v941_v9  ;;  %v2136_v61 = vld [vmem:[%s2346_s2 + $0x24] ss:$8 sm:$0xf] }
 0x14f   :  { %v2116_v55 = vadd.f32 %v959_v33, %v807_v0  ;;  %v823_v54 = vpop.permute.xlu1 %822  ;;  %v966_v20 = vadd.f32 %v958_v34, %v806_v45  ;;  %v2121_v37 = vpop.permute.xlu0 %1235  ;;  %v2348_v0 = vperm.slane %v2077_v27, 3 }
 0x150   :  { %v839_v7 = vsel %vm836_vm10, %v1976_v32, %v823_v54  ;;  %v840_v29 = vsel %vm836_vm10, %v823_v54, %v1242_v21  ;;  %v1237_v63 = vunpack.i.l.bf16 %v2121_v37  ;;  %v793_v32 = vperm.slane %v2028_v60, 3  ;;  %v2147_v21 = vld [vmem:[%s2346_s2 + $0x23] ss:$8 sm:$0xf] }
 0x151   :  { %v855_v52 = vsub.f32 %v1292_v3, %v839_v7  ;;  %v856_v50 = vsub.f32 %v1322_v14, %v840_v29  ;;  %v2353_v7 = vperm.slane %v2136_v61, 2  ;;  %v1030_v4 = vperm.slane %v2147_v21, 0 }
 0x152   :  { %v760_v45 = vsel %vm756_vm9, %v1947_v53, %v1237_v63  ;;  %v2357_v60 = vperm.slane %v2077_v27, 2 }
 0x153   :  { %v863_v46 = vand.u32 2147483647, %v855_v52  ;;  %v864_v39 = vand.u32 2147483647, %v856_v50  ;;  %v776_v38 = vsub.f32 %v1322_v14, %v760_v45  ;;  %v2142_v53 = vpop.permute.xlu2 %1062 }
 0x154   :  { %v1079_v29 = vsel %vm1076_vm11, %v2095_v12, %v2142_v53 }
 0x155   :  { %v880_v9 = vmul.f32 %v2350_v41, %v863_v46  ;;  %v881_v33 = vmul.f32 %v2348_v0, %v864_v39  ;;  %v784_v34 = vand.u32 2147483647, %v776_v38  ;;  %v1095_v50 = vsub.f32 %v1292_v3, %v1079_v29 }
 0x156   :  { %v2354_v39 = vperm.slane %v2147_v21, 1 }
 0x157   :  { %v2150_v54 = vadd.f32 %v880_v9, %v2009_v49  ;;  %v979_v52 = vpop.permute.xlu1 %978  ;;  %v2157_v63 = vadd.f32 %v881_v33, %v2012_v11  ;;  %v977_v45 = vpop.permute.xlu0 %976  ;;  %v801_v49 = vmul.f32 %v793_v32, %v784_v34  ;;  %v1103_v0 = vand.u32 2147483647, %v1095_v50 }
 0x158   :  { %v998_v46 = vsel %vm996_vm12, %v979_v52, %v2072_v35  ;;  %v997_v9 = vsel %vm996_vm12, %v977_v45, %v979_v52 }
 0x159   :  { %v1014_v38 = vsub.f32 %v1324_v15, %v998_v46  ;;  %v1013_v11 = vsub.f32 %v1298_v6, %v997_v9  ;;  %v809_v33 = vadd.f32 %v801_v49, %v1930_v8  ;;  %v1120_v41 = vmul.f32 %v2353_v7, %v1103_v0 }
 0x15b   :  { %v1022_v29 = vand.u32 2147483647, %v1014_v38  ;;  %v1021_v5 = vand.u32 2147483647, %v1013_v11  ;;  %v1128_v10 = vadd.f32 %v1120_v41, %v2087_v25  ;;  %v2177_v50 = vpop.permute.xlu2 %828  ;;  %v1111_v38 = vperm.slane %v2136_v61, 1 }
 0x15c   :  { %v1110_v41 = vperm.slane %v2136_v61, 0 }
 0x15d   :  { %v1039_v34 = vmul.f32 %v2354_v39, %v1022_v29  ;;  %v1038_v52 = vmul.f32 %v1030_v4, %v1021_v5  ;;  %v1238_v39 = vunpack.i.h.bf16 %v2121_v37 }
 0x15f   :  { %v1047_v46 = vadd.f32 %v1039_v34, %v2098_v16  ;;  %v1059_v45 = vpop.permute.xlu1 %1058  ;;  %v1046_v8 = vadd.f32 %v1038_v52, %v2101_v2  ;;  %v1057_v0 = vpop.permute.xlu0 %1056 }
 0x160   :  { %v1078_v49 = vsel %vm1076_vm11, %v1059_v45, %v2095_v12  ;;  %v1077_v25 = vsel %vm1076_vm11, %v1057_v0, %v1059_v45 }
 0x161   :  { %v1094_v9 = vsub.f32 %v1324_v15, %v1078_v49  ;;  %v1093_v5 = vsub.f32 %v1298_v6, %v1077_v25 }
 0x163   :  { %v1102_v11 = vand.u32 2147483647, %v1094_v9  ;;  %v1101_v29 = vand.u32 2147483647, %v1093_v5  ;;  %v985_v12 = vpop.permute.xlu2 %984 }
 0x165   :  { %v1119_v16 = vmul.f32 %v1111_v38, %v1102_v11  ;;  %v1118_v2 = vmul.f32 %v1110_v41, %v1101_v29 }
 0x167   :  { %v1127_v34 = vadd.f32 %v1119_v16, %v2116_v55  ;;  %v749_v52 = vpop.permute.xlu1 %748  ;;  %v1126_v7 = vadd.f32 %v1118_v2, %v966_v20  ;;  %v747_v15 = vpop.permute.xlu0 %746  ;;  %v1032_v20 = vperm.slane %v2147_v21, 2 }
 0x169   :  { %v1135_v49 = vadd.f32 %v1127_v34, %v1047_v46  ;;  %v1134_v45 = vadd.f32 %v1126_v7, %v1046_v8 }
 0x16b   :  { %v1142_v0 = vadd.f32 %v1135_v49, %v1134_v45  ;;  %v2194_v6 = vpop.permute.xlu2 %752 }
 0x16c   :  { %v764_v9 = vsel %vm756_vm9, %v2194_v6, %v1238_v39 }
 0x16d   :  { %v780_v5 = vsub.f32 %v1347_v22, %v764_v9 }
 0x16f   :  { %v983_v25 = vpop.permute.xlu1 %982  ;;  %v2201_v55 = vpop.permute.xlu0 %1245  ;;  %v788_v37 = vand.u32 2147483647, %v780_v5 }
 0x170   :  { %v999_v11 = vsel %vm996_vm12, %v2072_v35, %v983_v25  ;;  %v1247_v46 = vunpack.i.l.bf16 %v2201_v55  ;;  %v953_v35 = vperm.slane %v2023_v43, 3 }
 0x171   :  { %v1015_v7 = vsub.f32 %v1292_v3, %v999_v11  ;;  %v805_v39 = vmul.f32 %v793_v32, %v788_v37 }
 0x172   :  { %v920_v29 = vsel %vm916_vm8, %v2036_v44, %v1247_v46 }
 0x173   :  { %v1023_v8 = vand.u32 2147483647, %v1015_v7  ;;  %v936_v16 = vsub.f32 %v1322_v14, %v920_v29  ;;  %v2215_v34 = vadd.f32 %v805_v39, %v1939_v58  ;;  %v1000_v39 = vsel %vm996_vm12, %v983_v25, %v985_v12 }
 0x175   :  { %v1040_v2 = vmul.f32 %v1032_v20, %v1023_v8  ;;  %v944_v3 = vand.u32 2147483647, %v936_v16  ;;  %v1016_v16 = vsub.f32 %v1322_v14, %v1000_v39 }
 0x177   :  { %v1048_v49 = vadd.f32 %v1040_v2, %v2150_v54  ;;  %v827_v45 = vpop.permute.xlu1 %826  ;;  %v751_v9 = vpop.permute.xlu0 %750  ;;  %v961_v44 = vmul.f32 %v953_v35, %v944_v3  ;;  %v1033_v3 = vperm.slane %v2147_v21, 3 }
 0x178   :  { %v762_v32 = vsel %vm756_vm9, %v749_v52, %v751_v9 }
 0x179   :  { %v1136_v5 = vadd.f32 %v1128_v10, %v1048_v49  ;;  %v778_v11 = vsub.f32 %v1351_v24, %v762_v32  ;;  %v969_v7 = vadd.f32 %v961_v44, %v809_v33  ;;  %v1233_v10 = vunpack.i.h.bf16 %v1981_v17  ;;  %v987_v44 = vpop.permute.xlu2 %986 }
 0x17a   :  { %v1024_v33 = vand.u32 2147483647, %v1016_v16  ;;  %v761_v17 = vsel %vm756_vm9, %v747_v15, %v749_v52 }
 0x17b   :  { %v1143_v46 = vadd.f32 %v1142_v0, %v1136_v5  ;;  %v786_v37 = vand.u32 2147483647, %v778_v11  ;;  %v1113_v5 = vperm.slane %v2136_v61, 3  ;;  %v777_v39 = vsub.f32 %v1320_v13, %v761_v17 }
 0x17c   :  { %v1041_v32 = vmul.f32 %v1033_v3, %v1024_v33 }
 0x17d   :  { %v803_v58 = vmul.f32 %v791_v59, %v786_v37 }
 0x17e   :  { %v1049_v15 = vadd.f32 %v1041_v32, %v2157_v63 }
 0x17f   :  { %v909_v8 = vpop.permute.xlu1 %908  ;;  %v2225_v29 = vadd.f32 %v803_v58, %v1961_v28  ;;  %v907_v54 = vpop.permute.xlu0 %906 }
 0x180   :  { %v921_v58 = vsel %vm916_vm8, %v907_v54, %v909_v8 }
 0x187   :  { %v673_v2 = vpop.permute.xlu1 %672  ;;  %v1065_v49 = vpop.permute.xlu0 %1064 }
 0x188   :  { %v684_v0 = vsel %vm676_vm7, %v673_v2, %v1233_v10  ;;  %v1080_v28 = vsel %vm1076_vm11, %v2142_v53, %v1065_v49  ;;  %v785_v49 = vand.u32 2147483647, %v777_v39  ;;  %v683_v39 = vsel %vm676_vm7, %v2006_v40, %v673_v2 }
 0x189   :  { %v700_v59 = vsub.f32 %v1347_v22, %v684_v0  ;;  %v1096_v12 = vsub.f32 %v1322_v14, %v1080_v28  ;;  %v841_v14 = vsel %vm836_vm10, %v827_v45, %v2177_v50  ;;  %v699_v40 = vsub.f32 %v1349_v23, %v683_v39 }
 0x18a   :  { %v857_v54 = vsub.f32 %v1320_v13, %v841_v14 }
 0x18b   :  { %v708_v25 = vand.u32 2147483647, %v700_v59  ;;  %v1104_v11 = vand.u32 2147483647, %v1096_v12  ;;  %v2254_v59 = vpop.permute.xlu2 %1068 }
 0x18d   :  { %v725_v37 = vmul.f32 %v713_v19, %v708_v25  ;;  %v1121_v53 = vmul.f32 %v1113_v5, %v1104_v11  ;;  %v937_v19 = vsub.f32 %v1320_v13, %v921_v58  ;;  %v865_v25 = vand.u32 2147483647, %v857_v54 }
 0x18f   :  { %v2249_v16 = vadd.f32 %v725_v37, %v1861_v57  ;;  %v911_v52 = vpop.permute.xlu1 %910  ;;  %v1129_v10 = vadd.f32 %v1121_v53, %v969_v7  ;;  %v831_v33 = vpop.permute.xlu0 %830  ;;  %v945_v12 = vand.u32 2147483647, %v937_v19  ;;  %v802_v57 = vmul.f32 %v790_v26, %v785_v49 }
 0x190   :  { %v763_v53 = vsel %vm756_vm9, %v751_v9, %v2194_v6 }
 0x191   :  { %v1137_v0 = vadd.f32 %v1129_v10, %v1049_v15  ;;  %v962_v17 = vmul.f32 %v950_v62, %v945_v12  ;;  %v810_v58 = vadd.f32 %v802_v57, %v1958_v56  ;;  %v922_v62 = vsel %vm916_vm8, %v909_v8, %v911_v52 }
 0x192   :  { %v779_v6 = vsub.f32 %v1349_v23, %v763_v53  ;;  %v938_v9 = vsub.f32 %v1351_v24, %v922_v62 }
 0x193   :  { %v1144_v28 = vadd.f32 %v1143_v46, %v1137_v0  ;;  %v882_v46 = vmul.f32 %v870_v18, %v865_v25  ;;  %v970_v15 = vadd.f32 %v962_v17, %v810_v58  ;;  %v991_v56 = vpop.permute.xlu2 %990  ;;  %v1248_v25 = vunpack.i.h.bf16 %v2201_v55 }
 0x194   :  { %v787_v57 = vand.u32 2147483647, %v779_v6 }
 0x196   :  { %v804_v58 = vmul.f32 %v792_v36, %v787_v57 }
 0x197   :  { %v1067_v45 = vpop.permute.xlu1 %1066  ;;  %v989_v7 = vpop.permute.xlu0 %988 }
 0x198   :  { %v1081_v63 = vsel %vm1076_vm11, %v1067_v45, %v2254_v59  ;;  %v1001_v11 = vsel %vm996_vm12, %v987_v44, %v989_v7  ;;  %v842_v44 = vsel %vm836_vm10, %v2177_v50, %v831_v33  ;;  %v707_v45 = vand.u32 2147483647, %v699_v40 }
 0x199   :  { %v1097_v32 = vsub.f32 %v1320_v13, %v1081_v63  ;;  %v1017_v37 = vsub.f32 %v1320_v13, %v1001_v11  ;;  %v890_v13 = vadd.f32 %v882_v46, %v2044_v42  ;;  %v858_v19 = vsub.f32 %v1351_v24, %v842_v44 }
 0x19a   :  { %v1002_v42 = vsel %vm996_vm12, %v989_v7, %v991_v56  ;;  %v946_v63 = vand.u32 2147483647, %v938_v9  ;;  %v724_v55 = vmul.f32 %v712_v30, %v707_v45 }
 0x19b   :  { %v1105_v26 = vand.u32 2147483647, %v1097_v32  ;;  %v1025_v14 = vand.u32 2147483647, %v1017_v37  ;;  %v866_v17 = vand.u32 2147483647, %v858_v19  ;;  %v1018_v32 = vsub.f32 %v1351_v24, %v1002_v42  ;;  %v1073_v37 = vpop.permute.xlu2 %1072 }
 0x19d   :  { %v1122_v18 = vmul.f32 %v1110_v41, %v1105_v26  ;;  %v1042_v10 = vmul.f32 %v1030_v4, %v1025_v14  ;;  %v2355_v26 = vperm.slane %v2023_v43, 1  ;;  %v1026_v14 = vand.u32 2147483647, %v1018_v32 }
 0x19f   :  { %v1130_v8 = vadd.f32 %v1122_v18, %v970_v15  ;;  %v913_v2 = vpop.permute.xlu1 %912  ;;  %v1050_v50 = vadd.f32 %v1042_v10, %v890_v13  ;;  %v833_v41 = vpop.permute.xlu0 %832  ;;  %v963_v53 = vmul.f32 %v2355_v26, %v946_v63  ;;  %v2358_v10 = vperm.slane %v2023_v43, 2 }
 0x1a0   :  { %v923_v54 = vsel %vm916_vm8, %v911_v52, %v913_v2  ;;  %v843_v0 = vsel %vm836_vm10, %v831_v33, %v833_v41  ;;  %v1243_v52 = vunpack.i.h.bf16 %v2114_v51  ;;  %v924_v7 = vsel %vm916_vm8, %v913_v2, %v1248_v25 }
 0x1a1   :  { %v1138_v49 = vadd.f32 %v1130_v8, %v1050_v50  ;;  %v939_v4 = vsub.f32 %v1349_v23, %v923_v54  ;;  %v859_v12 = vsub.f32 %v1349_v23, %v843_v0  ;;  %v940_v15 = vsub.f32 %v1347_v22, %v924_v7 }
 0x1a2   :  { %v844_v39 = vsel %vm836_vm10, %v833_v41, %v1243_v52  ;;  %v812_v8 = vadd.f32 %v804_v58, %v1955_v48  ;;  %v732_v2 = vadd.f32 %v724_v55, %v1877_v47  ;;  %v971_v50 = vadd.f32 %v963_v53, %v2225_v29 }
 0x1a3   :  { %v1145_v11 = vadd.f32 %v1144_v28, %v1138_v49  ;;  %v867_v46 = vand.u32 2147483647, %v859_v12  ;;  %v947_v33 = vand.u32 2147483647, %v939_v4  ;;  %v2356_v28 = vperm.slane %v2077_v27, 1 }
 0x1a4   :  { %v860_v40 = vsub.f32 %v1347_v22, %v844_v39  ;;  %v948_v49 = vand.u32 2147483647, %v940_v15  ;;  %v2360_v48 = vperm.slane %v2136_v61, 2 }
 0x1a5   :  { %v883_v51 = vmul.f32 %v2356_v28, %v866_v17  ;;  %v884_v36 = vmul.f32 %v2357_v60, %v867_v46  ;;  %v964_v6 = vmul.f32 %v2358_v10, %v947_v33 }
 0x1a6   :  { %v868_v12 = vand.u32 2147483647, %v860_v40  ;;  %v965_v52 = vmul.f32 %v953_v35, %v948_v49 }
 0x1a7   :  { %v993_v62 = vpop.permute.xlu1 %992  ;;  %v1071_v18 = vpop.permute.xlu0 %1070  ;;  %v891_v0 = vadd.f32 %v883_v51, %v2047_v31  ;;  %v892_v4 = vadd.f32 %v884_v36, %v732_v2 }
 0x1a8   :  { %v1003_v44 = vsel %vm996_vm12, %v991_v56, %v993_v62  ;;  %v1082_v30 = vsel %vm1076_vm11, %v2254_v59, %v1071_v18  ;;  %v1083_v13 = vsel %vm1076_vm11, %v1071_v18, %v1073_v37  ;;  %v2359_v59 = vperm.slane %v2147_v21, 1 }
 0x1a9   :  { %v1019_v1 = vsub.f32 %v1349_v23, %v1003_v44  ;;  %v1098_v9 = vsub.f32 %v1351_v24, %v1082_v30  ;;  %v1099_v56 = vsub.f32 %v1349_v23, %v1083_v13  ;;  %v972_v23 = vadd.f32 %v964_v6, %v812_v8 }
 0x1aa   :  { %v1043_v54 = vmul.f32 %v2359_v59, %v1026_v14 }
 0x1ab   :  { %v1027_v19 = vand.u32 2147483647, %v1019_v1  ;;  %v1106_v41 = vand.u32 2147483647, %v1098_v9  ;;  %v1107_v42 = vand.u32 2147483647, %v1099_v56 }
 0x1ac   :  { %v1051_v45 = vadd.f32 %v1043_v54, %v891_v0 }
 0x1ad   :  { %v1044_v24 = vmul.f32 %v1032_v20, %v1027_v19  ;;  %v1123_v47 = vmul.f32 %v1111_v38, %v1106_v41  ;;  %v1124_v29 = vmul.f32 %v2360_v48, %v1107_v42  ;;  %v2361_v38 = vperm.slane %v2077_v27, 3 }
 0x1af   :  { %v1052_v25 = vadd.f32 %v1044_v24, %v892_v4  ;;  %v1075_v57 = vpop.permute.xlu1 %1074  ;;  %v1131_v63 = vadd.f32 %v1123_v47, %v971_v50  ;;  %v1132_v17 = vadd.f32 %v1124_v29, %v972_v23  ;;  %v995_v32 = vpop.permute.xlu0 %994  ;;  %v885_v46 = vmul.f32 %v2361_v38, %v868_v12 }
 0x1b0   :  { %v1084_v31 = vsel %vm1076_vm11, %v1073_v37, %v1075_v57  ;;  %v1004_v7 = vsel %vm996_vm12, %v993_v62, %v995_v32  ;;  %v973_v37 = vadd.f32 %v965_v52, %v2215_v34 }
 0x1b1   :  { %v1100_v20 = vsub.f32 %v1347_v22, %v1084_v31  ;;  %v1020_v33 = vsub.f32 %v1347_v22, %v1004_v7  ;;  %v1139_v58 = vadd.f32 %v1131_v63, %v1051_v45  ;;  %v1140_v55 = vadd.f32 %v1132_v17, %v1052_v25 }
 0x1b2   :  { %v893_v35 = vadd.f32 %v885_v46, %v2249_v16 }
 0x1b3   :  { %v1108_v26 = vand.u32 2147483647, %v1100_v20  ;;  %v1028_v53 = vand.u32 2147483647, %v1020_v33  ;;  %v1146_v39 = vadd.f32 %v1145_v11, %v1139_v58 }
 0x1b5   :  { %v1125_v43 = vmul.f32 %v1113_v5, %v1108_v26  ;;  %v1045_v62 = vmul.f32 %v1033_v3, %v1028_v53  ;;  %v1147_v28 = vadd.f32 %v1146_v39, %v1140_v55 }
 0x1b7   :  { %v1133_v27 = vadd.f32 %v1125_v43, %v973_v37  ;;  %v1053_v51 = vadd.f32 %v1045_v62, %v893_v35 }
 0x1b9   :  { %v1141_v14 = vadd.f32 %v1133_v27, %v1053_v51 }
 0x1bb   :  { %v1148_v22 = vadd.f32 %v1147_v28, %v1141_v14 }
 0x1bd   :  { %1149 = vadd.xlane.f32.xlu2 %v1148_v22 }
 0x230   :  { %v1150_v15 = vpop.xlane.xlu2 %1149 }
 0x231   :  { %v1151_v44 = vrot.slane %v1150_v15, 4 }
 0x233   :  { %v1152_v18 = vadd.f32 %v1151_v44, %v1150_v15 }
 0x235   :  { %v1153_v11 = vrot.slane %v1152_v18, 2 }
 0x237   :  { %v1154_v60 = vadd.f32 %v1153_v11, %v1152_v18 }
 0x239   :  { %v1155_v34 = vrot.slane %v1154_v60, 1 }
 0x23b   :  { %v1156_v36 = vadd.f32 %v1155_v34, %v1154_v60 }
 0x23d   :  { %1178 = vpush %v1156_v36 }
 0x26e   :  { %s1179_s2 = spop %1178 }
 0x26f   :  { %v1158_v61 = vstv %s1179_s2 }
 0x270   :  { %1160 = vst [vmem:[%s2347_s3] sm:$0xff] %v1158_v61 }

</bundles_post_ra>
